<compile_context>
chip_gen: v6e
topology: v6e:2x2x1
jax: 0.10.0
libtpu: 0.0.40
codegen_flags: <defaults>
</compile_context>

<pallas_src>
import math
import functools

import jax
import jax.numpy as jnp
from jax.experimental import pallas as pl
from jax.experimental.pallas import tpu as pltpu


# ---------------------------------------------------------------------------
# Per-generation VMEM budget / tile defaults
# ---------------------------------------------------------------------------

def _vmem_limit_bytes():
    """Scoped-VMEM budget derived from the chip (v7x: 64 MiB/TC, v5e/v6e: 128 MiB)."""
    mib = 1024 * 1024
    try:
        cap = int(getattr(pltpu.get_tpu_info(), "vmem_capacity_bytes", 0))
    except Exception:
        cap = 0
    if cap <= 0:
        return 32 * mib                                  # unknown chip: stay conservative
    if cap <= 64 * mib:                                  # v7x-class (64 MiB per TC)
        return max(16 * mib, min(40 * mib, cap - 8 * mib))
    return min(96 * mib, cap - 16 * mib)                 # v5e / v6e-class (128 MiB)


_VMEM_LIMIT = _vmem_limit_bytes()
if _VMEM_LIMIT >= 64 * 1024 * 1024:
    # v5e/v6e (128 MiB VMEM): larger tiles get closer to the HBM roofline.
    _LIN_TM, _LIN_TN, _LIN_TK = 512, 512, 1024
else:
    # v7x (64 MiB/TC) or unknown: bounded per-step footprint.
    _LIN_TM, _LIN_TN, _LIN_TK = 256, 256, 512


def _pick_tile(dim, target, align):
    """Largest `align`-multiple divisor of `dim` that is <= `target`.

    Never silently returns a huge full dimension when an aligned divisor exists;
    falls back to the full dim only when `dim` has no aligned divisor at all.
    """
    if dim <= target:
        return dim
    t = (target // align) * align
    while t >= align:
        if dim % t == 0:
            return t
        t -= align
    # TODO(synk): use pl.cdiv + masked tail blocks for large dims with no aligned
    # divisor instead of one full-dim block.
    return dim


# ---------------------------------------------------------------------------
# Tiled in-projection linear (y = x @ wt + b, wt already pre-transposed (K, N))
# ---------------------------------------------------------------------------

def _linear_kernel(x_ref, wt_ref, b_ref, o_ref, acc_ref):
    # x: (tm, tk), wt: (tk, tn), b: (1, tn) -> o: (tm, tn); acc: f32 scratch.
    k = pl.program_id(2)

    @pl.when(k == 0)
    def _():
        acc_ref[...] = jnp.zeros_like(acc_ref)

    # bf16 MXU operands, f32 accumulation (~2-4x MXU throughput vs f32 inputs).
    acc_ref[...] += jnp.dot(x_ref[...].astype(jnp.bfloat16),
                            wt_ref[...].astype(jnp.bfloat16),
                            preferred_element_type=jnp.float32)

    @pl.when(k == pl.num_programs(2) - 1)
    def _():
        o_ref[...] = (acc_ref[...] + b_ref[...]).astype(o_ref.dtype)


def linear_pallas(x, wt, b2):
    """y = x @ wt + b2.  x: (M, K), wt: (K, N) pre-transposed weight, b2: (1, N)."""
    M, K = x.shape
    N = wt.shape[1]
    tm = _pick_tile(M, _LIN_TM, 8)
    tn = _pick_tile(N, _LIN_TN, 128)
    tk = _pick_tile(K, _LIN_TK, 128)
    grid = (M // tm, N // tn, K // tk)
    # TODO(synk): if the K loop shows exposed weight DMA at large K, add
    # pipeline_mode=pl.Buffered(3) on the weight BlockSpec.
    return pl.pallas_call(
        _linear_kernel,
        out_shape=jax.ShapeDtypeStruct((M, N), x.dtype),
        grid=grid,
        in_specs=[
            pl.BlockSpec((tm, tk), lambda i, j, k: (i, k)),
            pl.BlockSpec((tk, tn), lambda i, j, k: (k, j)),
            pl.BlockSpec((1, tn), lambda i, j, k: (0, j)),
        ],
        out_specs=pl.BlockSpec((tm, tn), lambda i, j, k: (i, j)),
        scratch_shapes=[pltpu.VMEM((tm, tn), jnp.float32)],
        compiler_params=pltpu.CompilerParams(
            dimension_semantics=("parallel", "parallel", "arbitrary"),
            vmem_limit_bytes=_VMEM_LIMIT,
        ),
    )(x, wt, b2)


# ---------------------------------------------------------------------------
# Out-projection with the (batch, time) -> (time, batch) reorder fused in
# ---------------------------------------------------------------------------

def _out_proj_kernel(x_ref, wt_ref, b_ref, o_ref, acc_ref):
    # x: (B, tmt, tk), wt: (tk, tn), b: (1, tn) -> o: (tmt, B, tn); acc: (B, tmt, tn) f32.
    k = pl.program_id(2)

    @pl.when(k == 0)
    def _():
        acc_ref[...] = jnp.zeros_like(acc_ref)

    wb = wt_ref[...].astype(jnp.bfloat16)
    for b in range(x_ref.shape[0]):       # static, small; reuses the pushed RHS on the MXU
        acc_ref[b] += jnp.dot(x_ref[b].astype(jnp.bfloat16), wb,
                              preferred_element_type=jnp.float32)

    @pl.when(k == pl.num_programs(2) - 1)
    def _():
        res = acc_ref[...] + b_ref[...]   # (B, tmt, tn)
        # Fused (batch, time) -> (time, batch) reorder on VMEM data: the final
        # output is written directly in (T, B, E) order, killing the old
        # post-attention transpose HBM pass.
        o_ref[...] = pltpu.einshape("btn->tbn", res).astype(o_ref.dtype)


def out_proj_pallas(x_bte, wt, b2):
    """out[t, b, :] = x_bte[b, t, :] @ wt + b2.  x_bte: (B, T, E) -> (T, B, N)."""
    B, T, E = x_bte.shape
    N = wt.shape[1]
    tmt = _pick_tile(T, max(8, _LIN_TM // max(B, 1)), 8)
    tn = _pick_tile(N, _LIN_TN, 128)
    tk = _pick_tile(E, _LIN_TK, 128)
    grid = (T // tmt, N // tn, E // tk)
    return pl.pallas_call(
        _out_proj_kernel,
        out_shape=jax.ShapeDtypeStruct((T, B, N), x_bte.dtype),
        grid=grid,
        in_specs=[
            pl.BlockSpec((B, tmt, tk), lambda ti, j, k: (0, ti, k)),
            pl.BlockSpec((tk, tn), lambda ti, j, k: (k, j)),
            pl.BlockSpec((1, tn), lambda ti, j, k: (0, j)),
        ],
        out_specs=pl.BlockSpec((tmt, B, tn), lambda ti, j, k: (ti, 0, j)),
        scratch_shapes=[pltpu.VMEM((B, tmt, tn), jnp.float32)],
        compiler_params=pltpu.CompilerParams(
            dimension_semantics=("parallel", "parallel", "arbitrary"),
            vmem_limit_bytes=_VMEM_LIMIT,
        ),
    )(x_bte, wt, b2)


# ---------------------------------------------------------------------------
# Attention: per (batch, query-tile) step, all heads, fused head-average
# ---------------------------------------------------------------------------

def _attn_kernel(q_ref, k_ref, v_ref, o_ref, *w_refs):
    # q_ref: (tq, H, D); k_ref/v_ref: (S, H, D); o_ref: (tq, H*D);
    # w_refs: ((tq, S),) iff need_weights.
    tq, H, D = q_ref.shape
    w_sum = None
    for h in range(H):                                        # static unrolled head loop
        qh = q_ref[:, h, :].astype(jnp.bfloat16)              # (tq, D), q pre-scaled
        kh = k_ref[:, h, :].astype(jnp.bfloat16)              # (S, D)
        vh = v_ref[:, h, :].astype(jnp.bfloat16)              # (S, D)
        # q @ k^T on the MXU: bf16 operands, f32 accumulation.
        s = jax.lax.dot_general(qh, kh, (((1,), (1,)), ((), ())),
                                preferred_element_type=jnp.float32)   # (tq, S)
        # Exact, numerically stable softmax in f32 (no approx reciprocal).
        m = jnp.max(s, axis=-1, keepdims=True)
        e = jnp.exp(s - m)
        p = e / jnp.sum(e, axis=-1, keepdims=True)
        o_h = jnp.dot(p.astype(jnp.bfloat16), vh,
                      preferred_element_type=jnp.float32)             # (tq, D)
        # Heads concatenated on the last dim -> the (tq, E) output block is
        # lane-dense and already in the layout the out-projection consumes.
        o_ref[:, h * D:(h + 1) * D] = o_h.astype(o_ref.dtype)
        if w_refs:
            w_sum = p if w_sum is None else w_sum + p
    if w_refs:
        # Fused need_weights=True head average, written once as (tq, S) f32.
        w_refs[0][...] = (w_sum * (1.0 / H)).astype(w_refs[0].dtype)


def _pick_attn_tile(T, S, H, D, need_weights, budget_bytes):
    """Largest query tile whose per-step VMEM footprint fits the budget."""
    E = H * D

    def fits(tq):
        inputs = 2 * 4 * (tq + 2 * S) * E                                 # dbl-buffered q,k,v
        outputs = 2 * 4 * (tq * E + (tq * S if need_weights else 0))      # dbl-buffered outs
        temps = 4 * 4 * tq * S + 4 * tq * E                               # scores/exp/probs
        return inputs + outputs + temps <= budget_bytes

    if T <= 8:
        return T
    for tq in (512, 256, 128, 64, 32, 16, 8):
        if tq <= T and T % tq == 0 and fits(tq):
            return tq
    for tq in (8, 16, 32, 64):
        if tq <= T and T % tq == 0:
            return tq
    return T


def attention_pallas(qkv5, *, need_weights=True):
    """qkv5: (T, B, 3, H, D) fused in-projection output (q already pre-scaled).

    Returns attn: (B, T, E) and, if need_weights, head-averaged weights (B, T, S).
    """
    T, B, _, H, D = qkv5.shape
    S = T                              # self-attention
    E = H * D
    tq = _pick_attn_tile(T, S, H, D, need_weights, _VMEM_LIMIT // 2)
    grid = (B, T // tq)                # (batch, query-tile): >=2 parallel steps for B>=2 (v7x 2 TCs)

    # q/k/v selection and per-head folding expressed purely via index_maps on the
    # fused (T, B, 3, H, D) activation: no jnp.split / head-fold transposes in HBM.
    in_specs = [
        pl.BlockSpec((tq, None, None, H, D), lambda b, ti: (ti, b, 0, 0, 0)),  # q tile
        pl.BlockSpec((S, None, None, H, D), lambda b, ti: (0, b, 1, 0, 0)),    # k (full S)
        pl.BlockSpec((S, None, None, H, D), lambda b, ti: (0, b, 2, 0, 0)),    # v (full S)
    ]
    o_spec = pl.BlockSpec((None, tq, E), lambda b, ti: (b, ti, 0))
    # TODO(synk): for very long S, additionally stream K/V in S-tiles with an
    # online-softmax (m/l/acc scratch) so the (tq, S) score block stays bounded;
    # need_weights=True forces the full (B, T, S) weight writeback regardless.
    params = pltpu.CompilerParams(
        dimension_semantics=("parallel", "parallel"),
        vmem_limit_bytes=_VMEM_LIMIT,
    )
    if need_weights:
        out, w = pl.pallas_call(
            _attn_kernel,
            out_shape=(jax.ShapeDtypeStruct((B, T, E), qkv5.dtype),
                       jax.ShapeDtypeStruct((B, T, S), jnp.float32)),
            grid=grid,
            in_specs=in_specs,
            out_specs=(o_spec, pl.BlockSpec((None, tq, S), lambda b, ti: (b, ti, 0))),
            compiler_params=params,
        )(qkv5, qkv5, qkv5)
        return out, w
    out = pl.pallas_call(
        _attn_kernel,
        out_shape=jax.ShapeDtypeStruct((B, T, E), qkv5.dtype),
        grid=grid,
        in_specs=in_specs,
        out_specs=o_spec,
        compiler_params=params,
    )(qkv5, qkv5, qkv5)
    return out, None


# ---------------------------------------------------------------------------
# Parameter handling
# ---------------------------------------------------------------------------

def init_params(key, embed_dim, num_heads):
    """Torch-layout parameters (same init scheme as the nn.Module)."""
    assert embed_dim % num_heads == 0
    k1, k2 = jax.random.split(key)
    in_bound = math.sqrt(6.0 / (3 * embed_dim + embed_dim))
    out_bound = math.sqrt(6.0 / (embed_dim + embed_dim))
    return {
        "in_proj_weight": jax.random.uniform(
            k1, (3 * embed_dim, embed_dim), jnp.float32, -in_bound, in_bound),
        "in_proj_bias": jnp.zeros((3 * embed_dim,), jnp.float32),
        "out_proj_weight": jax.random.uniform(
            k2, (embed_dim, embed_dim), jnp.float32, -out_bound, out_bound),
        "out_proj_bias": jnp.zeros((embed_dim,), jnp.float32),
    }


def prepare_params(params, num_heads):
    """Pre-transpose projection weights once and fold the q scaling (D**-0.5)
    into the q slice of the in-projection weight/bias."""
    E = params["out_proj_weight"].shape[0]
    D = E // num_heads
    scaling = D ** (-0.5)
    scale_vec = jnp.concatenate([
        jnp.full((E,), scaling, jnp.float32),
        jnp.ones((2 * E,), jnp.float32),
    ])
    in_w_t = params["in_proj_weight"].T * scale_vec[None, :]           # (E, 3E)
    in_b = (params["in_proj_bias"] * scale_vec).reshape(1, 3 * E)
    return {
        "in_w_t": in_w_t,
        "in_b": in_b,
        "out_w_t": params["out_proj_weight"].T,                         # (E, E)
        "out_b": params["out_proj_bias"].reshape(1, E),
    }


# ---------------------------------------------------------------------------
# Forward pass
# ---------------------------------------------------------------------------

@functools.partial(jax.jit, static_argnames=("num_heads", "need_weights"))
def protected_mha_forward(query, prepared, *, num_heads, need_weights=True):
    """Self-attention forward.  query: (T, B, E).

    Returns (attn: (T, B, E), head-averaged attn_weights: (B, T, S) or None)."""
    T, B, E = query.shape
    H = num_heads
    D = E // H

    x = query.reshape(T * B, E)                                    # free row-major reshape
    qkv = linear_pallas(x, prepared["in_w_t"], prepared["in_b"])   # (T*B, 3E), q pre-scaled
    qkv5 = qkv.reshape(T, B, 3, H, D)                              # free reshape (no HBM pass)

    attn_bte, attn_w = attention_pallas(qkv5, need_weights=need_weights)     # (B, T, E)

    out = out_proj_pallas(attn_bte, prepared["out_w_t"], prepared["out_b"])  # (T, B, E)
    # TODO(synk): activations are kept f32 between kernels to match the module's
    # numerics; bf16 activations would halve the remaining HBM traffic.
    return out, attn_w


# ---------------------------------------------------------------------------
# Pure-JAX reference (uses the original torch-layout params)
# ---------------------------------------------------------------------------

def _reference(query, params, num_heads):
    T, B, E = query.shape
    H, D = num_heads, E // num_heads
    scaling = D ** (-0.5)
    x = query.reshape(T * B, E)
    qkv = x @ params["in_proj_weight"].T + params["in_proj_bias"]
    q, k, v = jnp.split(qkv, 3, axis=-1)
    q = q * scaling
    qh = q.reshape(T, B * H, D).transpose(1, 0, 2)
    kh = k.reshape(T, B * H, D).transpose(1, 0, 2)
    vh = v.reshape(T, B * H, D).transpose(1, 0, 2)
    s = jnp.einsum("btd,bsd->bts", qh, kh)
    p = jax.nn.softmax(s, axis=-1)
    o = jnp.einsum("bts,bsd->btd", p, vh)
    o = o.transpose(1, 0, 2).reshape(T, B, E)
    o = o.reshape(T * B, E) @ params["out_proj_weight"].T + params["out_proj_bias"]
    o = o.reshape(T, B, E)
    pw = p.reshape(B, H, T, T).sum(axis=1) / H
    return o, pw


# ---------------------------------------------------------------------------

if __name__ == "__main__":
    embed_dim = 32
    num_heads = 4
    tgt_len = 8
    bsz = 2

    key = jax.random.PRNGKey(0)
    k_param, k_query = jax.random.split(key)
    params = init_params(k_param, embed_dim, num_heads)
    prepared = prepare_params(params, num_heads)

    # Input shape: Time x Batch x Channel (self-attention: q = k = v = query).
    query = jax.random.normal(k_query, (tgt_len, bsz, embed_dim), jnp.float32)

    attn, attn_weights = protected_mha_forward(
        query, prepared, num_heads=num_heads, need_weights=True)
    attn = jax.block_until_ready(attn)
    attn_weights = jax.block_until_ready(attn_weights)

    ref_attn, ref_w = _reference(query, params, num_heads)
    assert attn.shape == (tgt_len, bsz, embed_dim)
    assert attn_weights.shape == (bsz, tgt_len, tgt_len)
    # Tolerance reflects bf16 MXU operands (f32 accumulation) in all matmuls;
    # softmax itself is exact f32.
    assert jnp.allclose(attn, ref_attn, atol=2e-2, rtol=2e-2), \
        float(jnp.max(jnp.abs(attn - ref_attn)))
    assert jnp.allclose(attn_weights, ref_w, atol=2e-2, rtol=2e-2), \
        float(jnp.max(jnp.abs(attn_weights - ref_w)))

    # TODO(synk): key_padding_mask / attn_mask / bias_kv / add_zero_attn /
    # incremental-state / dropout paths are not exercised (no-mask self-attention only).
    print("KERNEL_OK")
</pallas_src>

<mosaic_0001>
module attributes {stable_mosaic.version = 11 : i64} {
  func.func @_linear_kernel(%arg0: i32, %arg1: i32, %arg2: i32, %arg3: memref<16x32xf32, #tpu.memory_space<vmem>>, %arg4: memref<32x96xf32, #tpu.memory_space<vmem>>, %arg5: memref<1x96xf32, #tpu.memory_space<vmem>>, %arg6: memref<16x96xf32, #tpu.memory_space<vmem>>, %arg7: memref<16x96xf32, #tpu.memory_space<vmem>>) attributes {dimension_semantics = [#tpu.dimension_semantics<parallel>, #tpu.dimension_semantics<parallel>, #tpu.dimension_semantics<arbitrary>], iteration_bounds = array<i64: 1, 1, 1>, scalar_prefetch = 0 : i64, scratch_operands = 1 : i64, tpu.core_type = #tpu.core_type<tc>, window_params = [{transform_indices = @transform_0, window_bounds = array<i64: 16, 32>}, {transform_indices = @transform_1, window_bounds = array<i64: 32, 96>}, {transform_indices = @transform_2, window_bounds = array<i64: 1, 96>}, {transform_indices = @transform_3, window_bounds = array<i64: 16, 96>}]} {
    %c0_i32 = arith.constant 0 : i32
    %0 = arith.cmpi eq, %arg2, %c0_i32 : i32
    %1 = arith.extui %0 : i1 to i32
    %c0_i32_0 = arith.constant 0 : i32
    %2 = arith.cmpi ne, %1, %c0_i32_0 : i32
    scf.if %2 {
      %cst_10 = arith.constant 0.000000e+00 : f32
      %14 = vector.broadcast %cst_10 : f32 to vector<16x96xf32>
      %c0_11 = arith.constant 0 : index
      %c0_12 = arith.constant 0 : index
      %15 = vector.load %arg7[%c0_11, %c0_12] : memref<16x96xf32, #tpu.memory_space<vmem>>, vector<16x96xf32>
      tpu.vector_store %arg7[%c0_11, %c0_12], %14 {strides = array<i32>} : memref<16x96xf32, #tpu.memory_space<vmem>>, vector<16x96xf32>,
    } else {
    }
    %c0 = arith.constant 0 : index
    %c0_1 = arith.constant 0 : index
    %3 = vector.load %arg7[%c0, %c0_1] : memref<16x96xf32, #tpu.memory_space<vmem>>, vector<16x96xf32>
    %c0_2 = arith.constant 0 : index
    %c0_3 = arith.constant 0 : index
    %4 = vector.load %arg3[%c0_2, %c0_3] : memref<16x32xf32, #tpu.memory_space<vmem>>, vector<16x32xf32>
    %5 = arith.truncf %4 : vector<16x32xf32> to vector<16x32xbf16>
    %c0_4 = arith.constant 0 : index
    %c0_5 = arith.constant 0 : index
    %6 = vector.load %arg4[%c0_4, %c0_5] : memref<32x96xf32, #tpu.memory_space<vmem>>, vector<32x96xf32>
    %7 = arith.truncf %6 : vector<32x96xf32> to vector<32x96xbf16>
    %cst = arith.constant dense<0.000000e+00> : vector<16x96xf32>
    %8 = tpu.matmul %5, %7, %cst {dimension_numbers = #tpu.dot_dimension_numbers<[1], [0], [0], [1], [0, 0, 1, 1], [], []>} : vector<16x32xbf16>, vector<32x96xbf16>, vector<16x96xf32> -> vector<16x96xf32>
    %9 = arith.addf %3, %8 : vector<16x96xf32>
    %c0_6 = arith.constant 0 : index
    %c0_7 = arith.constant 0 : index
    %10 = vector.load %arg7[%c0_6, %c0_7] : memref<16x96xf32, #tpu.memory_space<vmem>>, vector<16x96xf32>
    tpu.vector_store %arg7[%c0_6, %c0_7], %9 {strides = array<i32>} : memref<16x96xf32, #tpu.memory_space<vmem>>, vector<16x96xf32>,
    %c0_i32_8 = arith.constant 0 : i32
    %11 = arith.cmpi eq, %arg2, %c0_i32_8 : i32
    %12 = arith.extui %11 : i1 to i32
    %c0_i32_9 = arith.constant 0 : i32
    %13 = arith.cmpi ne, %12, %c0_i32_9 : i32
    scf.if %13 {
      %c0_10 = arith.constant 0 : index
      %c0_11 = arith.constant 0 : index
      %14 = vector.load %arg7[%c0_10, %c0_11] : memref<16x96xf32, #tpu.memory_space<vmem>>, vector<16x96xf32>
      %c0_12 = arith.constant 0 : index
      %c0_13 = arith.constant 0 : index
      %15 = vector.load %arg5[%c0_12, %c0_13] : memref<1x96xf32, #tpu.memory_space<vmem>>, vector<1x96xf32>
      %16 = vector.broadcast %15 : vector<1x96xf32> to vector<16x96xf32>
      %17 = arith.addf %14, %16 : vector<16x96xf32>
      %c0_14 = arith.constant 0 : index
      %c0_15 = arith.constant 0 : index
      %18 = vector.load %arg6[%c0_14, %c0_15] : memref<16x96xf32, #tpu.memory_space<vmem>>, vector<16x96xf32>
      tpu.vector_store %arg6[%c0_14, %c0_15], %17 {strides = array<i32>} : memref<16x96xf32, #tpu.memory_space<vmem>>, vector<16x96xf32>,
    } else {
    }
    return
  }
  func.func @transform_0(%arg0: i32, %arg1: i32, %arg2: i32) -> (i32, i32) {
    %c0_i32 = arith.constant 0 : i32
    return %arg0, %arg2 : i32, i32
  }
  func.func @transform_1(%arg0: i32, %arg1: i32, %arg2: i32) -> (i32, i32) {
    %c0_i32 = arith.constant 0 : i32
    return %arg2, %arg1 : i32, i32
  }
  func.func @transform_2(%arg0: i32, %arg1: i32, %arg2: i32) -> (i32, i32) {
    %c0_i32 = arith.constant 0 : i32
    %c0_i32_0 = arith.constant 0 : i32
    return %c0_i32, %arg1 : i32, i32
  }
  func.func @transform_3(%arg0: i32, %arg1: i32, %arg2: i32) -> (i32, i32) {
    %c0_i32 = arith.constant 0 : i32
    return %arg0, %arg1 : i32, i32
  }
}

module attributes {stable_mosaic.version = 11 : i64} {
  func.func @_out_proj_kernel(%arg0: i32, %arg1: i32, %arg2: i32, %arg3: memref<2x8x32xf32, #tpu.memory_space<vmem>>, %arg4: memref<32x32xf32, #tpu.memory_space<vmem>>, %arg5: memref<1x32xf32, #tpu.memory_space<vmem>>, %arg6: memref<8x2x32xf32, #tpu.memory_space<vmem>>, %arg7: memref<2x8x32xf32, #tpu.memory_space<vmem>>) attributes {dimension_semantics = [#tpu.dimension_semantics<parallel>, #tpu.dimension_semantics<parallel>, #tpu.dimension_semantics<arbitrary>], iteration_bounds = array<i64: 1, 1, 1>, scalar_prefetch = 0 : i64, scratch_operands = 1 : i64, tpu.core_type = #tpu.core_type<tc>, window_params = [{transform_indices = @transform_0, window_bounds = array<i64: 2, 8, 32>}, {transform_indices = @transform_1, window_bounds = array<i64: 32, 32>}, {transform_indices = @transform_2, window_bounds = array<i64: 1, 32>}, {transform_indices = @transform_3, window_bounds = array<i64: 8, 2, 32>}]} {
    %c0_i32 = arith.constant 0 : i32
    %0 = arith.cmpi eq, %arg2, %c0_i32 : i32
    %1 = arith.extui %0 : i1 to i32
    %c0_i32_0 = arith.constant 0 : i32
    %2 = arith.cmpi ne, %1, %c0_i32_0 : i32
    scf.if %2 {
      %cst_22 = arith.constant 0.000000e+00 : f32
      %28 = vector.broadcast %cst_22 : f32 to vector<2x8x32xf32>
      %c0_23 = arith.constant 0 : index
      %c0_24 = arith.constant 0 : index
      %c0_25 = arith.constant 0 : index
      %29 = vector.load %arg7[%c0_23, %c0_24, %c0_25] : memref<2x8x32xf32, #tpu.memory_space<vmem>>, vector<2x8x32xf32>
      tpu.vector_store %arg7[%c0_23, %c0_24, %c0_25], %28 {strides = array<i32>} : memref<2x8x32xf32, #tpu.memory_space<vmem>>, vector<2x8x32xf32>,
    } else {
    }
    %c0 = arith.constant 0 : index
    %c0_1 = arith.constant 0 : index
    %3 = vector.load %arg4[%c0, %c0_1] : memref<32x32xf32, #tpu.memory_space<vmem>>, vector<32x32xf32>
    %4 = arith.truncf %3 : vector<32x32xf32> to vector<32x32xbf16>
    %c0_2 = arith.constant 0 : index
    %c0_3 = arith.constant 0 : index
    %c0_4 = arith.constant 0 : index
    %5 = vector.load %arg7[%c0_2, %c0_3, %c0_4] : memref<2x8x32xf32, #tpu.memory_space<vmem>>, vector<1x8x32xf32>
    %6 = vector.shape_cast %5 : vector<1x8x32xf32> to vector<8x32xf32>
    %c0_5 = arith.constant 0 : index
    %c0_6 = arith.constant 0 : index
    %c0_7 = arith.constant 0 : index
    %7 = vector.load %arg3[%c0_5, %c0_6, %c0_7] : memref<2x8x32xf32, #tpu.memory_space<vmem>>, vector<1x8x32xf32>
    %8 = vector.shape_cast %7 : vector<1x8x32xf32> to vector<8x32xf32>
    %9 = arith.truncf %8 : vector<8x32xf32> to vector<8x32xbf16>
    %cst = arith.constant dense<0.000000e+00> : vector<8x32xf32>
    %10 = tpu.matmul %9, %4, %cst {dimension_numbers = #tpu.dot_dimension_numbers<[1], [0], [0], [1], [0, 0, 1, 1], [], []>} : vector<8x32xbf16>, vector<32x32xbf16>, vector<8x32xf32> -> vector<8x32xf32>
    %11 = arith.addf %6, %10 : vector<8x32xf32>
    %c0_8 = arith.constant 0 : index
    %c0_9 = arith.constant 0 : index
    %c0_10 = arith.constant 0 : index
    %12 = vector.load %arg7[%c0_8, %c0_9, %c0_10] : memref<2x8x32xf32, #tpu.memory_space<vmem>>, vector<1x8x32xf32>
    %13 = vector.shape_cast %12 : vector<1x8x32xf32> to vector<8x32xf32>
    %14 = vector.shape_cast %11 : vector<8x32xf32> to vector<1x8x32xf32>
    tpu.vector_store %arg7[%c0_8, %c0_9, %c0_10], %14 {strides = array<i32>} : memref<2x8x32xf32, #tpu.memory_space<vmem>>, vector<1x8x32xf32>,
    %c1 = arith.constant 1 : index
    %c0_11 = arith.constant 0 : index
    %c0_12 = arith.constant 0 : index
    %15 = vector.load %arg7[%c1, %c0_11, %c0_12] : memref<2x8x32xf32, #tpu.memory_space<vmem>>, vector<1x8x32xf32>
    %16 = vector.shape_cast %15 : vector<1x8x32xf32> to vector<8x32xf32>
    %c1_13 = arith.constant 1 : index
    %c0_14 = arith.constant 0 : index
    %c0_15 = arith.constant 0 : index
    %17 = vector.load %arg3[%c1_13, %c0_14, %c0_15] : memref<2x8x32xf32, #tpu.memory_space<vmem>>, vector<1x8x32xf32>
    %18 = vector.shape_cast %17 : vector<1x8x32xf32> to vector<8x32xf32>
    %19 = arith.truncf %18 : vector<8x32xf32> to vector<8x32xbf16>
    %cst_16 = arith.constant dense<0.000000e+00> : vector<8x32xf32>
    %20 = tpu.matmul %19, %4, %cst_16 {dimension_numbers = #tpu.dot_dimension_numbers<[1], [0], [0], [1], [0, 0, 1, 1], [], []>} : vector<8x32xbf16>, vector<32x32xbf16>, vector<8x32xf32> -> vector<8x32xf32>
    %21 = arith.addf %16, %20 : vector<8x32xf32>
    %c1_17 = arith.constant 1 : index
    %c0_18 = arith.constant 0 : index
    %c0_19 = arith.constant 0 : index
    %22 = vector.load %arg7[%c1_17, %c0_18, %c0_19] : memref<2x8x32xf32, #tpu.memory_space<vmem>>, vector<1x8x32xf32>
    %23 = vector.shape_cast %22 : vector<1x8x32xf32> to vector<8x32xf32>
    %24 = vector.shape_cast %21 : vector<8x32xf32> to vector<1x8x32xf32>
    tpu.vector_store %arg7[%c1_17, %c0_18, %c0_19], %24 {strides = array<i32>} : memref<2x8x32xf32, #tpu.memory_space<vmem>>, vector<1x8x32xf32>,
    %c0_i32_20 = arith.constant 0 : i32
    %25 = arith.cmpi eq, %arg2, %c0_i32_20 : i32
    %26 = arith.extui %25 : i1 to i32
    %c0_i32_21 = arith.constant 0 : i32
    %27 = arith.cmpi ne, %26, %c0_i32_21 : i32
    scf.if %27 {
      %c0_22 = arith.constant 0 : index
      %c0_23 = arith.constant 0 : index
      %c0_24 = arith.constant 0 : index
      %28 = vector.load %arg7[%c0_22, %c0_23, %c0_24] : memref<2x8x32xf32, #tpu.memory_space<vmem>>, vector<2x8x32xf32>
      %c0_25 = arith.constant 0 : index
      %c0_26 = arith.constant 0 : index
      %29 = vector.load %arg5[%c0_25, %c0_26] : memref<1x32xf32, #tpu.memory_space<vmem>>, vector<1x32xf32>
      %30 = vector.shape_cast %29 : vector<1x32xf32> to vector<1x1x32xf32>
      %31 = vector.broadcast %30 : vector<1x1x32xf32> to vector<2x8x32xf32>
      %32 = arith.addf %28, %31 : vector<2x8x32xf32>
      %33 = tpu.transpose %32, [1, 0, 2] : vector<2x8x32xf32> -> vector<8x2x32xf32>
      %c0_27 = arith.constant 0 : index
      %c0_28 = arith.constant 0 : index
      %c0_29 = arith.constant 0 : index
      %34 = vector.load %arg6[%c0_27, %c0_28, %c0_29] : memref<8x2x32xf32, #tpu.memory_space<vmem>>, vector<8x2x32xf32>
      tpu.vector_store %arg6[%c0_27, %c0_28, %c0_29], %33 {strides = array<i32>} : memref<8x2x32xf32, #tpu.memory_space<vmem>>, vector<8x2x32xf32>,
    } else {
    }
    return
  }
  func.func @transform_0(%arg0: i32, %arg1: i32, %arg2: i32) -> (i32, i32, i32) {
    %c0_i32 = arith.constant 0 : i32
    %c0_i32_0 = arith.constant 0 : i32
    return %c0_i32, %arg0, %arg2 : i32, i32, i32
  }
  func.func @transform_1(%arg0: i32, %arg1: i32, %arg2: i32) -> (i32, i32) {
    %c0_i32 = arith.constant 0 : i32
    return %arg2, %arg1 : i32, i32
  }
  func.func @transform_2(%arg0: i32, %arg1: i32, %arg2: i32) -> (i32, i32) {
    %c0_i32 = arith.constant 0 : i32
    %c0_i32_0 = arith.constant 0 : i32
    return %c0_i32, %arg1 : i32, i32
  }
  func.func @transform_3(%arg0: i32, %arg1: i32, %arg2: i32) -> (i32, i32, i32) {
    %c0_i32 = arith.constant 0 : i32
    %c0_i32_0 = arith.constant 0 : i32
    return %arg0, %c0_i32, %arg1 : i32, i32, i32
  }
}

module attributes {stable_mosaic.version = 11 : i64} {
  func.func @_attn_kernel(%arg0: i32, %arg1: i32, %arg2: memref<8x1x1x4x8xf32, #tpu.memory_space<vmem>>, %arg3: memref<8x1x1x4x8xf32, #tpu.memory_space<vmem>>, %arg4: memref<8x1x1x4x8xf32, #tpu.memory_space<vmem>>, %arg5: memref<1x8x32xf32, #tpu.memory_space<vmem>>, %arg6: memref<1x8x8xf32, #tpu.memory_space<vmem>>) attributes {dimension_semantics = [#tpu.dimension_semantics<parallel>, #tpu.dimension_semantics<parallel>], iteration_bounds = array<i64: 2, 1>, scalar_prefetch = 0 : i64, scratch_operands = 0 : i64, tpu.core_type = #tpu.core_type<tc>, window_params = [{transform_indices = @transform_0, window_bounds = array<i64: 8, 1, 1, 4, 8>}, {transform_indices = @transform_1, window_bounds = array<i64: 8, 1, 1, 4, 8>}, {transform_indices = @transform_2, window_bounds = array<i64: 8, 1, 1, 4, 8>}, {transform_indices = @transform_3, window_bounds = array<i64: 1, 8, 32>}, {transform_indices = @transform_4, window_bounds = array<i64: 1, 8, 8>}]} {
    %c0 = arith.constant 0 : index
    %c0_0 = arith.constant 0 : index
    %c0_1 = arith.constant 0 : index
    %c0_2 = arith.constant 0 : index
    %c0_3 = arith.constant 0 : index
    %0 = vector.load %arg2[%c0, %c0_0, %c0_1, %c0_2, %c0_3] : memref<8x1x1x4x8xf32, #tpu.memory_space<vmem>>, vector<8x1x1x1x8xf32>
    %1 = vector.shape_cast %0 : vector<8x1x1x1x8xf32> to vector<8x8xf32>
    %2 = arith.truncf %1 : vector<8x8xf32> to vector<8x8xbf16>
    %c0_4 = arith.constant 0 : index
    %c0_5 = arith.constant 0 : index
    %c0_6 = arith.constant 0 : index
    %c0_7 = arith.constant 0 : index
    %c0_8 = arith.constant 0 : index
    %3 = vector.load %arg3[%c0_4, %c0_5, %c0_6, %c0_7, %c0_8] : memref<8x1x1x4x8xf32, #tpu.memory_space<vmem>>, vector<8x1x1x1x8xf32>
    %4 = vector.shape_cast %3 : vector<8x1x1x1x8xf32> to vector<8x8xf32>
    %5 = arith.truncf %4 : vector<8x8xf32> to vector<8x8xbf16>
    %c0_9 = arith.constant 0 : index
    %c0_10 = arith.constant 0 : index
    %c0_11 = arith.constant 0 : index
    %c0_12 = arith.constant 0 : index
    %c0_13 = arith.constant 0 : index
    %6 = vector.load %arg4[%c0_9, %c0_10, %c0_11, %c0_12, %c0_13] : memref<8x1x1x4x8xf32, #tpu.memory_space<vmem>>, vector<8x1x1x1x8xf32>
    %7 = vector.shape_cast %6 : vector<8x1x1x1x8xf32> to vector<8x8xf32>
    %8 = arith.truncf %7 : vector<8x8xf32> to vector<8x8xbf16>
    %cst = arith.constant dense<0.000000e+00> : vector<8x8xf32>
    %9 = tpu.matmul %2, %5, %cst {dimension_numbers = #tpu.dot_dimension_numbers<[1], [1], [0], [0], [0, 0, 1, 0], [], []>} : vector<8x8xbf16>, vector<8x8xbf16>, vector<8x8xf32> -> vector<8x8xf32>
    %cst_14 = arith.constant dense<0xFF800000> : vector<8xf32>
    %10 = vector.multi_reduction <maximumf>, %9, %cst_14 [1] : vector<8x8xf32> to vector<8xf32>
    %11 = vector.shape_cast %10 : vector<8xf32> to vector<8x1xf32>
    %12 = vector.broadcast %11 : vector<8x1xf32> to vector<8x8xf32>
    %13 = arith.subf %9, %12 : vector<8x8xf32>
    %14 = math.exp %13 : vector<8x8xf32>
    %cst_15 = arith.constant dense<0.000000e+00> : vector<8xf32>
    %15 = vector.multi_reduction <add>, %14, %cst_15 [1] : vector<8x8xf32> to vector<8xf32>
    %16 = vector.shape_cast %15 : vector<8xf32> to vector<8x1xf32>
    %17 = vector.broadcast %16 : vector<8x1xf32> to vector<8x8xf32>
    %18 = arith.divf %14, %17 : vector<8x8xf32>
    %19 = arith.truncf %18 : vector<8x8xf32> to vector<8x8xbf16>
    %cst_16 = arith.constant dense<0.000000e+00> : vector<8x8xf32>
    %20 = tpu.matmul %19, %8, %cst_16 {dimension_numbers = #tpu.dot_dimension_numbers<[1], [0], [0], [1], [0, 0, 1, 1], [], []>} : vector<8x8xbf16>, vector<8x8xbf16>, vector<8x8xf32> -> vector<8x8xf32>
    %c0_17 = arith.constant 0 : index
    %c0_18 = arith.constant 0 : index
    %c0_19 = arith.constant 0 : index
    %21 = vector.load %arg5[%c0_17, %c0_18, %c0_19] : memref<1x8x32xf32, #tpu.memory_space<vmem>>, vector<1x8x8xf32>
    %22 = vector.shape_cast %21 : vector<1x8x8xf32> to vector<8x8xf32>
    %23 = vector.shape_cast %20 : vector<8x8xf32> to vector<1x8x8xf32>
    tpu.vector_store %arg5[%c0_17, %c0_18, %c0_19], %23 {strides = array<i32>} : memref<1x8x32xf32, #tpu.memory_space<vmem>>, vector<1x8x8xf32>,
    %c0_20 = arith.constant 0 : index
    %c0_21 = arith.constant 0 : index
    %c0_22 = arith.constant 0 : index
    %c1 = arith.constant 1 : index
    %c0_23 = arith.constant 0 : index
    %24 = vector.load %arg2[%c0_20, %c0_21, %c0_22, %c1, %c0_23] : memref<8x1x1x4x8xf32, #tpu.memory_space<vmem>>, vector<8x1x1x1x8xf32>
    %25 = vector.shape_cast %24 : vector<8x1x1x1x8xf32> to vector<8x8xf32>
    %26 = arith.truncf %25 : vector<8x8xf32> to vector<8x8xbf16>
    %c0_24 = arith.constant 0 : index
    %c0_25 = arith.constant 0 : index
    %c0_26 = arith.constant 0 : index
    %c1_27 = arith.constant 1 : index
    %c0_28 = arith.constant 0 : index
    %27 = vector.load %arg3[%c0_24, %c0_25, %c0_26, %c1_27, %c0_28] : memref<8x1x1x4x8xf32, #tpu.memory_space<vmem>>, vector<8x1x1x1x8xf32>
    %28 = vector.shape_cast %27 : vector<8x1x1x1x8xf32> to vector<8x8xf32>
    %29 = arith.truncf %28 : vector<8x8xf32> to vector<8x8xbf16>
    %c0_29 = arith.constant 0 : index
    %c0_30 = arith.constant 0 : index
    %c0_31 = arith.constant 0 : index
    %c1_32 = arith.constant 1 : index
    %c0_33 = arith.constant 0 : index
    %30 = vector.load %arg4[%c0_29, %c0_30, %c0_31, %c1_32, %c0_33] : memref<8x1x1x4x8xf32, #tpu.memory_space<vmem>>, vector<8x1x1x1x8xf32>
    %31 = vector.shape_cast %30 : vector<8x1x1x1x8xf32> to vector<8x8xf32>
    %32 = arith.truncf %31 : vector<8x8xf32> to vector<8x8xbf16>
    %cst_34 = arith.constant dense<0.000000e+00> : vector<8x8xf32>
    %33 = tpu.matmul %26, %29, %cst_34 {dimension_numbers = #tpu.dot_dimension_numbers<[1], [1], [0], [0], [0, 0, 1, 0], [], []>} : vector<8x8xbf16>, vector<8x8xbf16>, vector<8x8xf32> -> vector<8x8xf32>
    %cst_35 = arith.constant dense<0xFF800000> : vector<8xf32>
    %34 = vector.multi_reduction <maximumf>, %33, %cst_35 [1] : vector<8x8xf32> to vector<8xf32>
    %35 = vector.shape_cast %34 : vector<8xf32> to vector<8x1xf32>
    %36 = vector.broadcast %35 : vector<8x1xf32> to vector<8x8xf32>
    %37 = arith.subf %33, %36 : vector<8x8xf32>
    %38 = math.exp %37 : vector<8x8xf32>
    %cst_36 = arith.constant dense<0.000000e+00> : vector<8xf32>
    %39 = vector.multi_reduction <add>, %38, %cst_36 [1] : vector<8x8xf32> to vector<8xf32>
    %40 = vector.shape_cast %39 : vector<8xf32> to vector<8x1xf32>
    %41 = vector.broadcast %40 : vector<8x1xf32> to vector<8x8xf32>
    %42 = arith.divf %38, %41 : vector<8x8xf32>
    %43 = arith.truncf %42 : vector<8x8xf32> to vector<8x8xbf16>
    %cst_37 = arith.constant dense<0.000000e+00> : vector<8x8xf32>
    %44 = tpu.matmul %43, %32, %cst_37 {dimension_numbers = #tpu.dot_dimension_numbers<[1], [0], [0], [1], [0, 0, 1, 1], [], []>} : vector<8x8xbf16>, vector<8x8xbf16>, vector<8x8xf32> -> vector<8x8xf32>
    %c0_38 = arith.constant 0 : index
    %c0_39 = arith.constant 0 : index
    %c8 = arith.constant 8 : index
    %45 = vector.load %arg5[%c0_38, %c0_39, %c8] : memref<1x8x32xf32, #tpu.memory_space<vmem>>, vector<1x8x8xf32>
    %46 = vector.shape_cast %45 : vector<1x8x8xf32> to vector<8x8xf32>
    %47 = vector.shape_cast %44 : vector<8x8xf32> to vector<1x8x8xf32>
    tpu.vector_store %arg5[%c0_38, %c0_39, %c8], %47 {strides = array<i32>} : memref<1x8x32xf32, #tpu.memory_space<vmem>>, vector<1x8x8xf32>,
    %48 = arith.addf %18, %42 : vector<8x8xf32>
    %c0_40 = arith.constant 0 : index
    %c0_41 = arith.constant 0 : index
    %c0_42 = arith.constant 0 : index
    %c2 = arith.constant 2 : index
    %c0_43 = arith.constant 0 : index
    %49 = vector.load %arg2[%c0_40, %c0_41, %c0_42, %c2, %c0_43] : memref<8x1x1x4x8xf32, #tpu.memory_space<vmem>>, vector<8x1x1x1x8xf32>
    %50 = vector.shape_cast %49 : vector<8x1x1x1x8xf32> to vector<8x8xf32>
    %51 = arith.truncf %50 : vector<8x8xf32> to vector<8x8xbf16>
    %c0_44 = arith.constant 0 : index
    %c0_45 = arith.constant 0 : index
    %c0_46 = arith.constant 0 : index
    %c2_47 = arith.constant 2 : index
    %c0_48 = arith.constant 0 : index
    %52 = vector.load %arg3[%c0_44, %c0_45, %c0_46, %c2_47, %c0_48] : memref<8x1x1x4x8xf32, #tpu.memory_space<vmem>>, vector<8x1x1x1x8xf32>
    %53 = vector.shape_cast %52 : vector<8x1x1x1x8xf32> to vector<8x8xf32>
    %54 = arith.truncf %53 : vector<8x8xf32> to vector<8x8xbf16>
    %c0_49 = arith.constant 0 : index
    %c0_50 = arith.constant 0 : index
    %c0_51 = arith.constant 0 : index
    %c2_52 = arith.constant 2 : index
    %c0_53 = arith.constant 0 : index
    %55 = vector.load %arg4[%c0_49, %c0_50, %c0_51, %c2_52, %c0_53] : memref<8x1x1x4x8xf32, #tpu.memory_space<vmem>>, vector<8x1x1x1x8xf32>
    %56 = vector.shape_cast %55 : vector<8x1x1x1x8xf32> to vector<8x8xf32>
    %57 = arith.truncf %56 : vector<8x8xf32> to vector<8x8xbf16>
    %cst_54 = arith.constant dense<0.000000e+00> : vector<8x8xf32>
    %58 = tpu.matmul %51, %54, %cst_54 {dimension_numbers = #tpu.dot_dimension_numbers<[1], [1], [0], [0], [0, 0, 1, 0], [], []>} : vector<8x8xbf16>, vector<8x8xbf16>, vector<8x8xf32> -> vector<8x8xf32>
    %cst_55 = arith.constant dense<0xFF800000> : vector<8xf32>
    %59 = vector.multi_reduction <maximumf>, %58, %cst_55 [1] : vector<8x8xf32> to vector<8xf32>
    %60 = vector.shape_cast %59 : vector<8xf32> to vector<8x1xf32>
    %61 = vector.broadcast %60 : vector<8x1xf32> to vector<8x8xf32>
    %62 = arith.subf %58, %61 : vector<8x8xf32>
    %63 = math.exp %62 : vector<8x8xf32>
    %cst_56 = arith.constant dense<0.000000e+00> : vector<8xf32>
    %64 = vector.multi_reduction <add>, %63, %cst_56 [1] : vector<8x8xf32> to vector<8xf32>
    %65 = vector.shape_cast %64 : vector<8xf32> to vector<8x1xf32>
    %66 = vector.broadcast %65 : vector<8x1xf32> to vector<8x8xf32>
    %67 = arith.divf %63, %66 : vector<8x8xf32>
    %68 = arith.truncf %67 : vector<8x8xf32> to vector<8x8xbf16>
    %cst_57 = arith.constant dense<0.000000e+00> : vector<8x8xf32>
    %69 = tpu.matmul %68, %57, %cst_57 {dimension_numbers = #tpu.dot_dimension_numbers<[1], [0], [0], [1], [0, 0, 1, 1], [], []>} : vector<8x8xbf16>, vector<8x8xbf16>, vector<8x8xf32> -> vector<8x8xf32>
    %c0_58 = arith.constant 0 : index
    %c0_59 = arith.constant 0 : index
    %c16 = arith.constant 16 : index
    %70 = vector.load %arg5[%c0_58, %c0_59, %c16] : memref<1x8x32xf32, #tpu.memory_space<vmem>>, vector<1x8x8xf32>
    %71 = vector.shape_cast %70 : vector<1x8x8xf32> to vector<8x8xf32>
    %72 = vector.shape_cast %69 : vector<8x8xf32> to vector<1x8x8xf32>
    tpu.vector_store %arg5[%c0_58, %c0_59, %c16], %72 {strides = array<i32>} : memref<1x8x32xf32, #tpu.memory_space<vmem>>, vector<1x8x8xf32>,
    %73 = arith.addf %48, %67 : vector<8x8xf32>
    %c0_60 = arith.constant 0 : index
    %c0_61 = arith.constant 0 : index
    %c0_62 = arith.constant 0 : index
    %c3 = arith.constant 3 : index
    %c0_63 = arith.constant 0 : index
    %74 = vector.load %arg2[%c0_60, %c0_61, %c0_62, %c3, %c0_63] : memref<8x1x1x4x8xf32, #tpu.memory_space<vmem>>, vector<8x1x1x1x8xf32>
    %75 = vector.shape_cast %74 : vector<8x1x1x1x8xf32> to vector<8x8xf32>
    %76 = arith.truncf %75 : vector<8x8xf32> to vector<8x8xbf16>
    %c0_64 = arith.constant 0 : index
    %c0_65 = arith.constant 0 : index
    %c0_66 = arith.constant 0 : index
    %c3_67 = arith.constant 3 : index
    %c0_68 = arith.constant 0 : index
    %77 = vector.load %arg3[%c0_64, %c0_65, %c0_66, %c3_67, %c0_68] : memref<8x1x1x4x8xf32, #tpu.memory_space<vmem>>, vector<8x1x1x1x8xf32>
    %78 = vector.shape_cast %77 : vector<8x1x1x1x8xf32> to vector<8x8xf32>
    %79 = arith.truncf %78 : vector<8x8xf32> to vector<8x8xbf16>
    %c0_69 = arith.constant 0 : index
    %c0_70 = arith.constant 0 : index
    %c0_71 = arith.constant 0 : index
    %c3_72 = arith.constant 3 : index
    %c0_73 = arith.constant 0 : index
    %80 = vector.load %arg4[%c0_69, %c0_70, %c0_71, %c3_72, %c0_73] : memref<8x1x1x4x8xf32, #tpu.memory_space<vmem>>, vector<8x1x1x1x8xf32>
    %81 = vector.shape_cast %80 : vector<8x1x1x1x8xf32> to vector<8x8xf32>
    %82 = arith.truncf %81 : vector<8x8xf32> to vector<8x8xbf16>
    %cst_74 = arith.constant dense<0.000000e+00> : vector<8x8xf32>
    %83 = tpu.matmul %76, %79, %cst_74 {dimension_numbers = #tpu.dot_dimension_numbers<[1], [1], [0], [0], [0, 0, 1, 0], [], []>} : vector<8x8xbf16>, vector<8x8xbf16>, vector<8x8xf32> -> vector<8x8xf32>
    %cst_75 = arith.constant dense<0xFF800000> : vector<8xf32>
    %84 = vector.multi_reduction <maximumf>, %83, %cst_75 [1] : vector<8x8xf32> to vector<8xf32>
    %85 = vector.shape_cast %84 : vector<8xf32> to vector<8x1xf32>
    %86 = vector.broadcast %85 : vector<8x1xf32> to vector<8x8xf32>
    %87 = arith.subf %83, %86 : vector<8x8xf32>
    %88 = math.exp %87 : vector<8x8xf32>
    %cst_76 = arith.constant dense<0.000000e+00> : vector<8xf32>
    %89 = vector.multi_reduction <add>, %88, %cst_76 [1] : vector<8x8xf32> to vector<8xf32>
    %90 = vector.shape_cast %89 : vector<8xf32> to vector<8x1xf32>
    %91 = vector.broadcast %90 : vector<8x1xf32> to vector<8x8xf32>
    %92 = arith.divf %88, %91 : vector<8x8xf32>
    %93 = arith.truncf %92 : vector<8x8xf32> to vector<8x8xbf16>
    %cst_77 = arith.constant dense<0.000000e+00> : vector<8x8xf32>
    %94 = tpu.matmul %93, %82, %cst_77 {dimension_numbers = #tpu.dot_dimension_numbers<[1], [0], [0], [1], [0, 0, 1, 1], [], []>} : vector<8x8xbf16>, vector<8x8xbf16>, vector<8x8xf32> -> vector<8x8xf32>
    %c0_78 = arith.constant 0 : index
    %c0_79 = arith.constant 0 : index
    %c24 = arith.constant 24 : index
    %95 = vector.load %arg5[%c0_78, %c0_79, %c24] : memref<1x8x32xf32, #tpu.memory_space<vmem>>, vector<1x8x8xf32>
    %96 = vector.shape_cast %95 : vector<1x8x8xf32> to vector<8x8xf32>
    %97 = vector.shape_cast %94 : vector<8x8xf32> to vector<1x8x8xf32>
    tpu.vector_store %arg5[%c0_78, %c0_79, %c24], %97 {strides = array<i32>} : memref<1x8x32xf32, #tpu.memory_space<vmem>>, vector<1x8x8xf32>,
    %98 = arith.addf %73, %92 : vector<8x8xf32>
    %cst_80 = arith.constant 2.500000e-01 : f32
    %99 = vector.broadcast %cst_80 : f32 to vector<8x8xf32>
    %100 = arith.mulf %98, %99 : vector<8x8xf32>
    %c0_81 = arith.constant 0 : index
    %c0_82 = arith.constant 0 : index
    %c0_83 = arith.constant 0 : index
    %101 = vector.load %arg6[%c0_81, %c0_82, %c0_83] : memref<1x8x8xf32, #tpu.memory_space<vmem>>, vector<1x8x8xf32>
    %102 = vector.shape_cast %101 : vector<1x8x8xf32> to vector<8x8xf32>
    %103 = vector.shape_cast %100 : vector<8x8xf32> to vector<1x8x8xf32>
    tpu.vector_store %arg6[%c0_81, %c0_82, %c0_83], %103 {strides = array<i32>} : memref<1x8x8xf32, #tpu.memory_space<vmem>>, vector<1x8x8xf32>,
    return
  }
  func.func @transform_0(%arg0: i32, %arg1: i32) -> (i32, i32, i32, i32, i32) {
    %c0_i32 = arith.constant 0 : i32
    %c0_i32_0 = arith.constant 0 : i32
    %c0_i32_1 = arith.constant 0 : i32
    %c0_i32_2 = arith.constant 0 : i32
    return %arg1, %arg0, %c0_i32, %c0_i32_0, %c0_i32_1 : i32, i32, i32, i32, i32
  }
  func.func @transform_1(%arg0: i32, %arg1: i32) -> (i32, i32, i32, i32, i32) {
    %c0_i32 = arith.constant 0 : i32
    %c1_i32 = arith.constant 1 : i32
    %c0_i32_0 = arith.constant 0 : i32
    %c0_i32_1 = arith.constant 0 : i32
    %c0_i32_2 = arith.constant 0 : i32
    return %c0_i32, %arg0, %c1_i32, %c0_i32_0, %c0_i32_1 : i32, i32, i32, i32, i32
  }
  func.func @transform_2(%arg0: i32, %arg1: i32) -> (i32, i32, i32, i32, i32) {
    %c0_i32 = arith.constant 0 : i32
    %c2_i32 = arith.constant 2 : i32
    %c0_i32_0 = arith.constant 0 : i32
    %c0_i32_1 = arith.constant 0 : i32
    %c0_i32_2 = arith.constant 0 : i32
    return %c0_i32, %arg0, %c2_i32, %c0_i32_0, %c0_i32_1 : i32, i32, i32, i32, i32
  }
  func.func @transform_3(%arg0: i32, %arg1: i32) -> (i32, i32, i32) {
    %c0_i32 = arith.constant 0 : i32
    %c0_i32_0 = arith.constant 0 : i32
    return %arg0, %arg1, %c0_i32 : i32, i32, i32
  }
  func.func @transform_4(%arg0: i32, %arg1: i32) -> (i32, i32, i32) {
    %c0_i32 = arith.constant 0 : i32
    %c0_i32_0 = arith.constant 0 : i32
    return %arg0, %arg1, %c0_i32 : i32, i32, i32
  }
}

</mosaic_0001>

<bundles_post_ra>
// kernel: protected_mha_forward.3
= control target key start
LH: loop header
LB: loop body
LE: loop exit
PB: predicated region body
PF: predicated region fallthrough
CT: control target
= control target key end

     0   :  { %8 = vsyncpa [#allocation4], 0  ;;  %s243_s0 = inlined_call_operand.hbm [shape: f32[16,32], index: 0, kind: input, shape index: {}]   ;;  %s244_s1 = inlined_call_operand.hbm [shape: f32[32,96], index: 1, kind: input, shape index: {}]   ;;  %s245_s2 = inlined_call_operand.vmem [shape: f32[1,96], index: 2, kind: input, shape index: {}]   ;;  %s246_s3 = inlined_call_operand.vmem [shape: f32[16,96], index: 3, kind: output, shape index: {}]  }
   0x1   :  { %9 = vsyncpa [#allocation6], 0  ;;  %s196_s12 = smov [#allocation3]  }
   0x2   :  { %s15_s13 = sshll.u32 %s196_s12, 4  ;;  %s16_s13 = int_to_ptr.vmem [resolvable:$true] %s15_s13 }
   0x3   :  { %s160_s14 = scalar_lea.vmem %s16_s13, 256  ;;  %p165_p1 = scmp.lt.s32.totalorder %s16_s13, %s16_s13 }
   0x4   :  { %p161_p0 = scmp.ne.s32.totalorder %s16_s13, %s160_s14  ;;  %p166_p2 = scmp.lt.s32.totalorder %s160_s14, %s160_s14 }
   0x6   :  { %p167_p3 = por %p166_p2, %p165_p1 }
   0x8   :  { %p168_p4 = pnand %p167_p3, %p161_p0 }
   0xa   :  { %171 = shalt.err (!%p168_p4)
}
   0xb   :  { %s197_s15 = smov 128   ;;  %s198_s16 = smov 8  }
   0xc   :  { %21 = dma.hbm_to_vmem [thread:$0]  %s243_s0, 256, %s16_s13, [#allocation4], %s197_s15, %s197_s15, %s198_s16  }
   0xd   :  { %s199_s19 = smov [#allocation5]  }
   0xe   :  { %s27_s20 = sshll.u32 %s199_s19, 4  ;;  %s28_s20 = int_to_ptr.vmem [resolvable:$true] %s27_s20 }
   0xf   :  { %s180_s21 = scalar_lea.vmem %s28_s20, 512  ;;  %p185_p6 = scmp.lt.s32.totalorder %s28_s20, %s28_s20 }
  0x10   :  { %p181_p5 = scmp.ne.s32.totalorder %s28_s20, %s180_s21  ;;  %p186_p7 = scmp.lt.s32.totalorder %s180_s21, %s180_s21 }
  0x12   :  { %p187_p8 = por %p186_p7, %p185_p6 }
  0x14   :  { %p188_p9 = pnand %p187_p8, %p181_p5 }
  0x16   :  { %191 = shalt.err (!%p188_p9)
}
  0x17   :  { %33 = dma.hbm_to_vmem [thread:$0]  %s244_s1, 512, %s28_s20, [#allocation6], %s197_s15, %s197_s15, %s198_s16  }
  0x18   :  { %192 = dma.done.wait [#allocation4], 256  }
  0x19   :  { %193 = vsyncadd [#allocation4], 4294967040 }
  0x1a   :  { %194 = dma.done.wait [#allocation6], 512  }
  0x1b   :  { %195 = vsyncadd [#allocation6], 4294966784  ;;  %vm47_vm0 = vcmask 785408   ;;  %v200_v0 = vmov 0.0   ;;  %vm201_vm1 = vmmov 0   ;;  %v57_v1 = vld [vmem:[#allocation5 + $0x10] sm:$0xff] }
  0x1c   :  { %48 = vst.msk [vmem:[#allocation2] sm:$0xff] %vm47_vm0, %v200_v0  ;;  %49 = vst.msk [vmem:[#allocation2 + $0x8] sm:$0xff] %vm47_vm0, %v200_v0  ;;  %138 = vmatprep.subr.bf16.mxu0 %v200_v0  ;;  %142 = vmatprep.mubr.msk.bf16.mxu0 %vm201_vm1, %v200_v0  ;;  %v58_v2 = vld [vmem:[#allocation5 + $0x18] sm:$0xff]  ;;  %v55_v3 = vld [vmem:[#allocation5] sm:$0xff]  ;;  %vm61_vm2 = vcmask 261120  }
  0x1d   :  { %v60_v4 = vpack.c.bf16 %v58_v2, %v57_v1  ;;  %v56_v5 = vld [vmem:[#allocation5 + $0x8] sm:$0xff]  ;;  %v52_v7 = vld [vmem:[#allocation3] sm:$0xff]  ;;  %v53_v8 = vld [vmem:[#allocation3 + $0x8] sm:$0xff] }
  0x1e   :  { %v59_v6 = vpack.c.bf16 %v56_v5, %v55_v3  ;;  %v54_v9 = vpack.c.bf16 %v53_v8, %v52_v7  ;;  %v134_v18 = vld [vmem:[%s245_s2] ss:$0 sm:$0xff] }
  0x1f   :  { %139 = vmatpush3.bf16.msra.mxu0 %v60_v4 }
  0x20   :  { %140 = vmatprep.subr.bf16.mxu0 %v200_v0 }
  0x23   :  { %141 = vmatpush3.bf16.msra.mxu0 %v59_v6  ;;  %v50_v10 = vld [vmem:[#allocation2] sm:$0xff]  ;;  %v51_v14 = vld [vmem:[#allocation2 + $0x8] sm:$0xff] }
  0x26   :  { %143 = vmatmul.mubr.msk.bf16.vlgmr.msra.gmra.mxu0 %vm61_vm2, %v54_v9 }
  0xe6   :  { %v99_v11 = vpop.f32.mrf.mxu0 }
  0xe7   :  { %v106_v12 = vadd.f32 %v99_v11, %v50_v10 }
  0xe8   :  { %v144_v13 = vpop.f32.mrf.mxu0 }
  0xe9   :  { %109 = vst.msk [vmem:[#allocation2] sm:$0xff] %vm47_vm0, %v106_v12 }
  0xea   :  { %v102_v15 = vpop.f32.mrf.mxu0 }
  0xeb   :  { %v107_v16 = vadd.f32 %v102_v15, %v51_v14 }
  0xec   :  { %v145_v17 = vpop.f32.mrf.mxu0 }
  0xed   :  { %110 = vst.msk [vmem:[#allocation2 + $0x8] sm:$0xff] %vm47_vm0, %v107_v16 }
  0xf0   :  { %v114_v19 = vld [vmem:[#allocation2] sm:$0xff] }
  0xf1   :  { %v123_v20 = vadd.f32 %v134_v18, %v114_v19 }
  0xf3   :  { %125 = vst.msk [vmem:[%s246_s3] sm:$0xff] %vm47_vm0, %v123_v20 }
  0xf4   :  { %v115_v21 = vld [vmem:[#allocation2 + $0x8] sm:$0xff] }
  0xf5   :  { %v124_v22 = vadd.f32 %v134_v18, %v115_v21 }
  0xf7   :  { %126 = vst.msk [vmem:[%s246_s3 + $0x8] sm:$0xff] %vm47_vm0, %v124_v22 }
  0xf8   :  { %131 = vsyncpa [#allocation4], 1 }
  0xf9   :  { %132 = vsyncpa [#allocation6], 1 }

// kernel: protected_mha_forward.5
= control target key start
LH: loop header
LB: loop body
LE: loop exit
PB: predicated region body
PF: predicated region fallthrough
CT: control target
= control target key end

     0   :  { %vm20_vm0 = vcmask 261120   ;;  %v288_v3 = vmov 0.0   ;;  %vm289_vm1 = vmmov 0   ;;  %s367_s0 = inlined_call_operand.vmem [shape: f32[2,8,32], index: 0, kind: input, shape index: {}]   ;;  %s368_s1 = inlined_call_operand.vmem [shape: f32[32,32], index: 1, kind: input, shape index: {}]   ;;  %s369_s2 = inlined_call_operand.vmem [shape: f32[1,32], index: 2, kind: input, shape index: {}]   ;;  %s370_s3 = inlined_call_operand.hbm [shape: f32[8,2,32], index: 3, kind: output, shape index: {}]  }
   0x1   :  { %v25_v0 = vld [vmem:[%s368_s1 + $0x10] sm:$0xff]  ;;  %v26_v1 = vld [vmem:[%s368_s1 + $0x18] sm:$0xff]  ;;  %v23_v2 = vld [vmem:[%s368_s1] sm:$0xff]  ;;  %243 = vmatprep.subr.bf16.mxu0 %v288_v3  ;;  %251 = vmatprep.subr.bf16.mxu1 %v288_v3  ;;  %21 = vst.msk [vmem:[#allocation2] sm:$0xff] %vm20_vm0, %v288_v3 }
   0x2   :  { %v28_v4 = vpack.c.bf16 %v26_v1, %v25_v0  ;;  %v24_v5 = vld [vmem:[%s368_s1 + $0x8] sm:$0xff]  ;;  %22 = vst.msk [vmem:[#allocation2 + $0x8] sm:$0xff] %vm20_vm0, %v288_v3  ;;  %247 = vmatprep.mubr.msk.bf16.mxu0 %vm289_vm1, %v288_v3  ;;  %255 = vmatprep.mubr.msk.bf16.mxu1 %vm289_vm1, %v288_v3 }
   0x3   :  { %8 = vsyncpa [#allocation4], 0  ;;  %v27_v6 = vpack.c.bf16 %v24_v5, %v23_v2  ;;  %v30_v7 = vld [vmem:[%s367_s0] sm:$0xff]  ;;  %v234_v8 = vld [vmem:[%s367_s0 + $0x8] sm:$0xff]  ;;  %v290_v14 = vmov 1983009808   ;;  %v146_v18 = vlaneseq }
   0x4   :  { %244 = vmatpush3.bf16.msra.mxu0 %v28_v4  ;;  %252 = vmatpush3.bf16.msra.mxu1 %v28_v4  ;;  %v31_v9 = vpack.c.bf16 %v30_v7, %v30_v7  ;;  %v82_v10 = vpack.c.bf16 %v234_v8, %v234_v8  ;;  %v144_v15 = vunpack.c.l.s4 %v290_v14  ;;  %v291_v24 = vmov 1934713408   ;;  %v236_v30 = vld [vmem:[%s369_s2] ss:$0 sm:$0xff]  ;;  %s292_s2 = smov [#allocation3]  }
   0x5   :  { %245 = vmatprep.subr.bf16.mxu0 %v288_v3  ;;  %253 = vmatprep.subr.bf16.mxu1 %v288_v3  ;;  %v175_v25 = vunpack.c.l.s4 %v291_v24  ;;  %v147_v27 = vshrl.u32 %v146_v18, 7  ;;  %vm208_vm2 = vcmask 254976   ;;  %s222_s24 = sshll.u32 %s292_s2, 4  ;;  %s223_s24 = int_to_ptr.vmem [resolvable:$true] %s222_s24 }
   0x6   :  { %v145_v26 = vunpack.c.0.s8 %v144_v15  ;;  %s266_s25 = scalar_lea.vmem %s223_s24, 256  ;;  %p271_p1 = scmp.lt.s32.totalorder %s223_s24, %s223_s24 }
   0x7   :  { %v176_v31 = vunpack.c.0.s8 %v175_v25  ;;  %p267_p0 = scmp.ne.s32.totalorder %s223_s24, %s266_s25  ;;  %p272_p2 = scmp.lt.s32.totalorder %s266_s25, %s266_s25 }
   0x8   :  { %246 = vmatpush3.bf16.msra.mxu0 %v27_v6  ;;  %254 = vmatpush3.bf16.msra.mxu1 %v27_v6  ;;  %v29_v11 = vld [vmem:[#allocation2] sm:$0xff]  ;;  %v148_v32 = vsub.s32 %v145_v26, %v147_v27 }
   0x9   :  { %v79_v12 = vld [vmem:[#allocation2 + $0x8] sm:$0xff]  ;;  %v179_v37 = vsub.s32 %v176_v31, %v147_v27  ;;  %p273_p3 = por %p272_p2, %p271_p1 }
   0xb   :  { %248 = vmatmul.mubr.msk.bf16.vlgmr.msra.gmra.mxu0 %vm20_vm0, %v31_v9  ;;  %256 = vmatmul.mubr.msk.bf16.vlgmr.msra.gmra.mxu1 %vm20_vm0, %v82_v10  ;;  %p274_p4 = pnand %p273_p3, %p267_p0 }
  0xcb   :  { %v70_v13 = vpop.f32.mrf.mxu0  ;;  %v120_v16 = vpop.f32.mrf.mxu1 }
  0xcc   :  { %v76_v17 = vadd.f32 %v70_v13, %v29_v11  ;;  %v126_v19 = vadd.f32 %v120_v16, %v79_v12 }
  0xcd   :  { %v249_v20 = vpop.f32.mrf.mxu0  ;;  %v257_v21 = vpop.f32.mrf.mxu1 }
  0xce   :  { %77 = vst.msk [vmem:[#allocation2] sm:$0xff] %vm20_vm0, %v76_v17  ;;  %127 = vst.msk [vmem:[#allocation2 + $0x8] sm:$0xff] %vm20_vm0, %v126_v19 }
  0xcf   :  { %v73_v22 = vpop.f32.mrf.mxu0  ;;  %v123_v23 = vpop.f32.mrf.mxu1 }
  0xd1   :  { %v250_v28 = vpop.f32.mrf.mxu0  ;;  %v258_v29 = vpop.f32.mrf.mxu1 }
  0xd5   :  { %v131_v33 = vld [vmem:[#allocation2] sm:$0xff]  ;;  %v132_v34 = vld [vmem:[#allocation2 + $0x8] sm:$0xff] }
  0xd6   :  { %v140_v35 = vadd.f32 %v236_v30, %v131_v33  ;;  %v141_v36 = vadd.f32 %v236_v30, %v132_v34 }
  0xd8   :  { %v142_v38 = vcombine.high %v140_v35, %v288_v3  ;;  %v149_v39 = vrot.slane %v140_v35, %v148_v32  ;;  %v157_v40 = vcombine.high %v141_v36, %v288_v3  ;;  %v164_v41 = vrot.slane %v141_v36, %v148_v32 }
  0xda   :  { %v156_v42 = vrot.slane %v142_v38, %v148_v32  ;;  %v171_v43 = vrot.slane %v157_v40, %v148_v32  ;;  %v172_v44 = vcombine.low %v149_v39, %v164_v41  ;;  %v173_v45 = vcombine.high %v149_v39, %v164_v41 }
  0xdc   :  { %v180_v46 = vrot.slane %v172_v44, %v179_v37  ;;  %v187_v47 = vrot.slane %v173_v45, %v179_v37  ;;  %v188_v48 = vcombine.low %v156_v42, %v171_v43  ;;  %v189_v49 = vcombine.high %v156_v42, %v171_v43 }
  0xde   :  { %v196_v50 = vrot.slane %v188_v48, %v179_v37  ;;  %v203_v51 = vrot.slane %v189_v49, %v179_v37  ;;  %v204_v52 = vcombine.high %v180_v46, %v288_v3  ;;  %v205_v53 = vcombine.high %v187_v47, %v288_v3  ;;  %209 = vst.msk [vmem:[#allocation3] sm:$0x3] %vm208_vm2, %v180_v46 }
  0xdf   :  { %211 = vst.msk [vmem:[#allocation3 + $0x4] sm:$0x3] %vm208_vm2, %v187_v47 }
  0xe0   :  { %v206_v54 = vcombine.high %v196_v50, %v288_v3  ;;  %v207_v55 = vcombine.high %v203_v51, %v288_v3  ;;  %210 = vst.msk [vmem:[#allocation3 + $0x2] sm:$0x3] %vm208_vm2, %v204_v52  ;;  %212 = vst.msk [vmem:[#allocation3 + $0x6] sm:$0x3] %vm208_vm2, %v205_v53 }
  0xe1   :  { %213 = vst.msk [vmem:[#allocation3 + $0x8] sm:$0x3] %vm208_vm2, %v196_v50  ;;  %215 = vst.msk [vmem:[#allocation3 + $0xc] sm:$0x3] %vm208_vm2, %v203_v51 }
  0xe2   :  { %214 = vst.msk [vmem:[#allocation3 + $0xa] sm:$0x3] %vm208_vm2, %v206_v54  ;;  %216 = vst.msk [vmem:[#allocation3 + $0xe] sm:$0x3] %vm208_vm2, %v207_v55 }
  0xe3   :  { %277 = shalt.err (!%p274_p4)
}
  0xe4   :  { %s293_s26 = smov 32   ;;  %s294_s27 = smov 2  }
  0xe5   :  { %228 = dma.vmem_to_hbm [thread:$0]  %s223_s24, 256, %s370_s3, [#allocation4], %s293_s26, %s293_s26, %s294_s27  }
  0xe6   :  { %286 = dma.done.wait [#allocation4], 256  }
  0xe7   :  { %287 = vsyncadd [#allocation4], 4294967040 }
  0xe8   :  { %232 = vsyncpa [#allocation4], 1 }

// kernel: protected_mha_forward.4
= control target key start
LH: loop header
LB: loop body
LE: loop exit
PB: predicated region body
PF: predicated region fallthrough
CT: control target
= control target key end

     0   :  { %10 = vsyncpa [#allocation6], 0  ;;  %s2393_s0 = inlined_call_operand.vmem [shape: f32[8,2,3,4,8], index: 0, kind: input, shape index: {}, may-alias: {0,1,2}]   ;;  %s2394_s1 = inlined_call_operand.vmem [shape: f32[8,2,3,4,8], index: 1, kind: input, shape index: {}, may-alias: {0,1,2}]   ;;  %s2395_s2 = inlined_call_operand.vmem [shape: f32[8,2,3,4,8], index: 2, kind: input, shape index: {}, may-alias: {0,1,2}]   ;;  %s2396_s3 = inlined_call_operand.vmem [shape: f32[2,8,32], index: 3, kind: output, shape index: {0}]   ;;  %s2397_s4 = inlined_call_operand.hbm [shape: f32[2,8,8], index: 4, kind: output, shape index: {1}]  }
   0x1   :  { %12 = vsyncpa [#allocation6 + $0x1], 0  ;;  %s1974_s15 = smov 0   ;;  %s1976_s16 = smov 0  }
   0x2   :  { %s1978_s17 = smov 0   ;;  %s1980_s18 = smov 0  }
   0x3   :  { %s1982_s19 = smov 0   ;;  %s1984_s20 = smov 0  }
   0x4 LB: > { %s1680_s21 = sadd.s32 4294967295, %s1941_s20   ;;  %s1681_s22 = sadd.s32 4294967294, %s1941_s20   ;;  %s1941_s20 = sphi %s1984_s20, %s18_s20   ;;  %s1937_s19 = sphi %s1982_s19, %s2407_s19   ;;  %s1933_s18 = sphi %s1980_s18, %s2406_s18   ;;  %s1929_s17 = sphi %s1978_s17, %s2405_s17   ;;  %s1925_s16 = sphi %s1976_s16, %s2404_s16   ;;  %s1921_s15 = sphi %s1974_s15, %s2403_s15  }
   0x5   : > { %s30_s23 = sadd.s32 1, %s1937_s19  ;;  %s39_s24 = sadd.s32 1, %s1929_s17 }
   0x6   : > { %p32_p0 = scmp.ge.s32.totalorder %s30_s23, 2  ;;  %p46_p1 = scmp.ne.s32.totalorder %s1929_s17, %s1925_s16 }
   0x7   : > { %p47_p2 = scmp.eq.s32.totalorder %s1941_s20, 0  ;;  %p158_p3 = scmp.eq.s32.totalorder %s1680_s21, 1 }
   0x8   : > { %s2409_s23 = smov (%p32_p0, %s30_s23), 0  ;;  %p163_p6 = scmp.ne.s32.totalorder %s1925_s16, %s1921_s15 }
   0x9   : > { %p2013_p4 = por %p47_p2, %p46_p1  ;;  %p2017_p5 = por %p158_p3, %p46_p1 }
   0xa   : > { %s35_s27 = ssub.s32 %s1937_s19, %s2409_s23  ;;  %p164_p8 = scmp.eq.s32.totalorder %s1681_s22, 1 }
   0xb   : > { %p37_p7 = scmp.eq.s32.totalorder %s35_s27, 0  ;;  %p2398_p10 = scmp.ge.s32.totalorder %s1941_s20, 2 }
   0xc   : > { %p2028_p9 = por %p164_p8, %p163_p6 }
   0xd   : > { %s2026_s28 = scalar_select %p37_p7, %s1929_s17, %s39_s24  }
   0xe   : > { %180 = sbr.rel (%p2398_p10) target bundleno = 49 (0x31), region = 16 }
  0x13   : > { %183 = sbr.rel (!%p2013_p4) target bundleno = 29 (0x1d), region = 20  ;;  %s185_s30 = sand.u32 (%p2013_p4), 1, %s1929_s17  }
  0x14   : > { %s1788_s5 = smul.u32 (%p2013_p4), 12, %s1937_s19  ;;  %s1684_s6 = sshll.u32 (%p2013_p4), %s185_s30, 5 }
  0x15   : > { %s187_s10 = scalar_lea.vmem (%p2013_p4), [#allocation2], %s1684_s6 }
  0x16   : > { %s193_s9 = scalar_lea.vmem (%p2013_p4), %s2393_s0, %s1788_s5 }
  0x17   : > { %v210_v0 = vld [vmem:[%s193_s9] sm:$0xf] (%p2013_p4)  ;;  %v212_v1 = vld [vmem:[%s193_s9 + $0x18] sm:$0xf] (%p2013_p4)  ;;  %v214_v2 = vld [vmem:[%s193_s9 + $0x30] sm:$0xf] (%p2013_p4) }
  0x18   : > { %211 = vst [vmem:[%s187_s10] sm:$0xf] %v210_v0  ;;  %213 = vst [vmem:[%s187_s10 + $0x4] sm:$0xf] %v212_v1  ;;  %v216_v3 = vld [vmem:[%s193_s9 + $0x48] sm:$0xf] }
  0x19   : > { %215 = vst [vmem:[%s187_s10 + $0x8] sm:$0xf] %v214_v2  ;;  %v218_v4 = vld [vmem:[%s193_s9 + $0x60] sm:$0xf]  ;;  %v220_v5 = vld [vmem:[%s193_s9 + $0x78] sm:$0xf] }
  0x1a   : > { %217 = vst [vmem:[%s187_s10 + $0xc] sm:$0xf] %v216_v3  ;;  %219 = vst [vmem:[%s187_s10 + $0x10] sm:$0xf] %v218_v4  ;;  %v222_v6 = vld [vmem:[%s193_s9 + $0x90] sm:$0xf] }
  0x1b   : > { %221 = vst [vmem:[%s187_s10 + $0x14] sm:$0xf] %v220_v5  ;;  %v224_v7 = vld [vmem:[%s193_s9 + $0xa8] sm:$0xf]  ;;  %223 = vst [vmem:[%s187_s10 + $0x18] sm:$0xf] %v222_v6 }
  0x1c   : > { %225 = vst [vmem:[%s187_s10 + $0x1c] sm:$0xf] %v224_v7 }
  0x1d PF: > { %265 = sbr.rel (!%p2013_p4) target bundleno = 39 (0x27), region = 61  ;;  %s267_s11 = sand.u32 (%p2013_p4), 1, %s1929_s17  }
  0x1e   : > { %s1687_s12 = smul.u32 (%p2013_p4), 12, %s1937_s19  ;;  %s1686_s13 = sshll.u32 (%p2013_p4), %s267_s11, 5 }
  0x1f   : > { %s269_s24 = scalar_lea.vmem (%p2013_p4), [#allocation3], %s1686_s13 }
  0x20   : > { %s1574_s22 = scalar_lea.vmem (%p2013_p4), %s2394_s1, %s1687_s12 }
  0x21   : > { %v1688_v8 = vld [vmem:[%s1574_s22 + $0x4] sm:$0xf] (%p2013_p4)  ;;  %v1689_v9 = vld [vmem:[%s1574_s22 + $0x1c] sm:$0xf] (%p2013_p4)  ;;  %v1690_v10 = vld [vmem:[%s1574_s22 + $0x34] sm:$0xf] (%p2013_p4) }
  0x22   : > { %291 = vst [vmem:[%s269_s24] sm:$0xf] %v1688_v8  ;;  %293 = vst [vmem:[%s269_s24 + $0x4] sm:$0xf] %v1689_v9  ;;  %v1691_v11 = vld [vmem:[%s1574_s22 + $0x4c] sm:$0xf] }
  0x23   : > { %295 = vst [vmem:[%s269_s24 + $0x8] sm:$0xf] %v1690_v10  ;;  %v1692_v12 = vld [vmem:[%s1574_s22 + $0x64] sm:$0xf]  ;;  %v1693_v13 = vld [vmem:[%s1574_s22 + $0x7c] sm:$0xf] }
  0x24   : > { %297 = vst [vmem:[%s269_s24 + $0xc] sm:$0xf] %v1691_v11  ;;  %299 = vst [vmem:[%s269_s24 + $0x10] sm:$0xf] %v1692_v12  ;;  %v1694_v14 = vld [vmem:[%s1574_s22 + $0x94] sm:$0xf] }
  0x25   : > { %301 = vst [vmem:[%s269_s24 + $0x14] sm:$0xf] %v1693_v13  ;;  %v1695_v15 = vld [vmem:[%s1574_s22 + $0xac] sm:$0xf]  ;;  %303 = vst [vmem:[%s269_s24 + $0x18] sm:$0xf] %v1694_v14 }
  0x26   : > { %305 = vst [vmem:[%s269_s24 + $0x1c] sm:$0xf] %v1695_v15 }
  0x27 PF: > { %345 = sbr.rel (!%p2013_p4) target bundleno = 49 (0x31), region = 102  ;;  %s347_s27 = sand.u32 (%p2013_p4), 1, %s1929_s17  }
  0x28   : > { %s1697_s30 = smul.u32 (%p2013_p4), 12, %s1937_s19  ;;  %s1696_s5 = sshll.u32 (%p2013_p4), %s347_s27, 5 }
  0x29   : > { %s349_s9 = scalar_lea.vmem (%p2013_p4), [#allocation4], %s1696_s5 }
  0x2a   : > { %s1580_s8 = scalar_lea.vmem (%p2013_p4), %s2395_s2, %s1697_s30 }
  0x2b   : > { %v1698_v16 = vld [vmem:[%s1580_s8 + $0x8] sm:$0xf] (%p2013_p4)  ;;  %v1699_v17 = vld [vmem:[%s1580_s8 + $0x20] sm:$0xf] (%p2013_p4)  ;;  %v1700_v18 = vld [vmem:[%s1580_s8 + $0x38] sm:$0xf] (%p2013_p4) }
  0x2c   : > { %371 = vst [vmem:[%s349_s9] sm:$0xf] %v1698_v16  ;;  %373 = vst [vmem:[%s349_s9 + $0x4] sm:$0xf] %v1699_v17  ;;  %v1701_v19 = vld [vmem:[%s1580_s8 + $0x50] sm:$0xf] }
  0x2d   : > { %375 = vst [vmem:[%s349_s9 + $0x8] sm:$0xf] %v1700_v18  ;;  %v1702_v20 = vld [vmem:[%s1580_s8 + $0x68] sm:$0xf]  ;;  %v1703_v21 = vld [vmem:[%s1580_s8 + $0x80] sm:$0xf] }
  0x2e   : > { %377 = vst [vmem:[%s349_s9 + $0xc] sm:$0xf] %v1701_v19  ;;  %379 = vst [vmem:[%s349_s9 + $0x10] sm:$0xf] %v1702_v20  ;;  %v1704_v22 = vld [vmem:[%s1580_s8 + $0x98] sm:$0xf] }
  0x2f   : > { %381 = vst [vmem:[%s349_s9 + $0x14] sm:$0xf] %v1703_v21  ;;  %v1705_v23 = vld [vmem:[%s1580_s8 + $0xb0] sm:$0xf]  ;;  %383 = vst [vmem:[%s349_s9 + $0x18] sm:$0xf] %v1704_v22 }
  0x30   : > { %385 = vst [vmem:[%s349_s9 + $0x1c] sm:$0xf] %v1705_v23 }
  0x31 PF: > { %p1706_p11 = scmp.ge.s32.totalorder %s1941_s20, 1  ;;  %p424_p12 = scmp.lt.s32.totalorder %s1941_s20, 3 }
  0x33   : > { %p425_p13 = pnand %p1706_p11, %p424_p12 }
  0x34   : > { %s2059_s25 = sand.u32 (!%p425_p13), 1, %s1925_s16   ;;  %p486_p0 = scmp.lt.s32.totalorder (!%p425_p13), %s1933_s18, 1 }
  0x35   : > { %428 = sbr.rel (%p425_p13) target bundleno = 1441 (0x5a1), region = 143  ;;  %s2063_s10 = sshll.u32 (!%p425_p13), %s2059_s25, 5 }
  0x36   : > { %s2067_s11 = scalar_lea.vmem (!%p425_p13), [#allocation3], %s2063_s10  ;;  %s2082_s12 = scalar_lea.vmem (!%p425_p13), [#allocation2], %s2063_s10 }
  0x37   : > { %s2117_s13 = scalar_lea.vmem (!%p425_p13), [#allocation4], %s2063_s10  ;;  %s1710_s30 = sshll.u32 (!%p425_p13), %s2059_s25, 3 }
  0x38   : > { %s484_s5 = scalar_lea.vmem (!%p425_p13), [#allocation5], %s1710_s30  ;;  %s1945_s6 = smov (!%p425_p13), 8  }
  0x39   : > { %s1721_s7 = sshll.u32 (!%p425_p13), %s1933_s18, 7  ;;  %s1532_s8 = sshll.u32 (!%p425_p13), %s484_s5, 4  ;;  %s1533_s8 = int_to_ptr.vmem [resolvable:$true] %s1532_s8 }
  0x3a   : > { %v1943_v24 = vmov 0.0   ;;  %vm559_vm0 = vcmask 1041409   ;;  %vm562_vm1 = vcmask 1042434   ;;  %vm565_vm2 = vcmask 1043459   ;;  %v510_v25 = vld [vmem:[%s2067_s11] sm:$0x1] }
  0x3b   : > { %1740 = vmatprep.subr.bf16.mxu0 %v1943_v24  ;;  %1746 = vmatprep.subr.bf16.mxu1 %v1943_v24  ;;  %vm568_vm3 = vcmask 1044484   ;;  %v511_v26 = vld [vmem:[%s2067_s11 + $0x4] sm:$0x1]  ;;  %v512_v27 = vld [vmem:[%s2067_s11 + $0x8] sm:$0x1]  ;;  %vm571_vm4 = vcmask 1045509   ;;  %v518_v31 = vpack.c.bf16 %v510_v25, %v510_v25 }
  0x3c   : > { %vm1944_vm5 = vmmov 0   ;;  %v513_v28 = vld [vmem:[%s2067_s11 + $0xc] sm:$0x1]  ;;  %v514_v29 = vld [vmem:[%s2067_s11 + $0x10] sm:$0x1]  ;;  %v519_v32 = vpack.c.bf16 %v511_v26, %v511_v26  ;;  %v520_v33 = vpack.c.bf16 %v512_v27, %v512_v27  ;;  %vm574_vm6 = vcmask 1046534  }
  0x3d   : > { %1742 = vmatprep.mubr.msk.bf16.mxu0 %vm1944_vm5, %v1943_v24  ;;  %1748 = vmatprep.mubr.msk.bf16.mxu1 %vm1944_vm5, %v1943_v24  ;;  %v515_v30 = vld [vmem:[%s2067_s11 + $0x14] sm:$0x1]  ;;  %v516_v34 = vld [vmem:[%s2067_s11 + $0x18] sm:$0x1]  ;;  %v517_v35 = vld [vmem:[%s2067_s11 + $0x1c] sm:$0x1]  ;;  %v521_v36 = vpack.c.bf16 %v513_v28, %v513_v28  ;;  %v522_v37 = vpack.c.bf16 %v514_v29, %v514_v29  ;;  %v588_v42 = vunpack.c.l.b16 %v518_v31 }
  0x3e   : > { %v523_v38 = vpack.c.bf16 %v515_v30, %v515_v30  ;;  %vm577_vm7 = vcmask 1047559   ;;  %v494_v39 = vld [vmem:[%s2082_s12] sm:$0x1]  ;;  %v524_v40 = vpack.c.bf16 %v516_v34, %v516_v34  ;;  %v525_v41 = vpack.c.bf16 %v517_v35, %v517_v35  ;;  %v495_v44 = vld [vmem:[%s2082_s12 + $0x4] sm:$0x1]  ;;  %s487_s14 = scalar_select %p486_p0, %s1933_s18, 1 }
  0x3f   : > { %v589_v43 = vunpack.c.l.b16 %v519_v32  ;;  %v590_v45 = vunpack.c.l.b16 %v520_v33  ;;  %v591_v46 = vunpack.c.l.b16 %v521_v36  ;;  %v592_v47 = vunpack.c.l.b16 %v522_v37  ;;  %v496_v49 = vld [vmem:[%s2082_s12 + $0x8] sm:$0x1]  ;;  %v497_v50 = vld [vmem:[%s2082_s12 + $0xc] sm:$0x1]  ;;  %v498_v51 = vld [vmem:[%s2082_s12 + $0x10] sm:$0x1] }
  0x40   : > { %v593_v48 = vunpack.c.l.b16 %v523_v38  ;;  %v594_v52 = vunpack.c.l.b16 %v524_v40  ;;  %v595_v53 = vunpack.c.l.b16 %v525_v41  ;;  %vm611_vm8 = vcmask 64512   ;;  %v499_v55 = vld [vmem:[%s2082_s12 + $0x14] sm:$0x1]  ;;  %v500_v56 = vld [vmem:[%s2082_s12 + $0x18] sm:$0x1]  ;;  %s1711_s21 = sshll.u32 %s487_s14, 3 }
  0x41   : > { %v596_v54 = vrot.slane %v589_v43, 7  ;;  %v502_v57 = vpack.c.bf16 %v494_v39, %v494_v39  ;;  %v598_v58 = vrot.slane %v590_v45, 6  ;;  %v600_v59 = vrot.slane %v591_v46, 5  ;;  %v501_v62 = vld [vmem:[%s2082_s12 + $0x1c] sm:$0x1]  ;;  %s2268_s27 = scalar_lea.vmem %s2396_s3, %s1711_s21  ;;  %s1946_s14 = smov [#allocation5]  }
  0x42   : > { %v602_v60 = vrot.slane %v592_v47, 4  ;;  %v604_v61 = vrot.slane %v593_v48, 3  ;;  %v606_v0 = vrot.slane %v594_v52, 2  ;;  %v608_v1 = vrot.slane %v595_v53, 1  ;;  %v528_v52 = vld [vmem:[%s2117_s13 + $0x8] sm:$0x1] }
  0x43   : > { %v597_v63 = vsel %vm559_vm0, %v596_v54, %v588_v42  ;;  %v503_v2 = vpack.c.bf16 %v495_v44, %v495_v44  ;;  %v504_v4 = vpack.c.bf16 %v496_v49, %v496_v49  ;;  %v505_v5 = vpack.c.bf16 %v497_v50, %v497_v50  ;;  %v526_v54 = vld [vmem:[%s2117_s13] sm:$0x1]  ;;  %s1869_s21 = sshll.u32 %s1946_s14, 4  ;;  %s1870_s21 = int_to_ptr.vmem [resolvable:$false] %s1869_s21 }
  0x44   : > { %v599_v3 = vsel %vm562_vm1, %v598_v58, %v597_v63  ;;  %v506_v6 = vpack.c.bf16 %v498_v51, %v498_v51  ;;  %v507_v8 = vpack.c.bf16 %v499_v55, %v499_v55  ;;  %v508_v9 = vpack.c.bf16 %v500_v56, %v500_v56  ;;  %v527_v51 = vld [vmem:[%s2117_s13 + $0x4] sm:$0x1]  ;;  %v529_v55 = vld [vmem:[%s2117_s13 + $0xc] sm:$0x1]  ;;  %v530_v56 = vld [vmem:[%s2117_s13 + $0x10] sm:$0x1]  ;;  %p1872_p4 = scmp.lt.s32.totalorder %s1533_s8, %s1870_s21 }
  0x45   : > { %v601_v7 = vsel %vm565_vm2, %v600_v59, %v599_v3  ;;  %v509_v10 = vpack.c.bf16 %v501_v62, %v501_v62  ;;  %v550_v12 = vunpack.c.l.b16 %v502_v57  ;;  %v551_v13 = vunpack.c.l.b16 %v503_v2  ;;  %v531_v58 = vld [vmem:[%s2117_s13 + $0x14] sm:$0x1]  ;;  %v532_v59 = vld [vmem:[%s2117_s13 + $0x18] sm:$0x1]  ;;  %s1871_s22 = scalar_lea.vmem %s1870_s21, 256 }
  0x46   : > { %v603_v11 = vsel %vm568_vm3, %v602_v60, %v601_v7  ;;  %v552_v14 = vunpack.c.l.b16 %v504_v4  ;;  %v553_v16 = vunpack.c.l.b16 %v505_v5  ;;  %v554_v17 = vunpack.c.l.b16 %v506_v6  ;;  %v533_v60 = vld [vmem:[%s2117_s13 + $0x1c] sm:$0x1] }
  0x47   : > { %v605_v15 = vsel %vm571_vm4, %v604_v61, %v603_v11  ;;  %v555_v18 = vunpack.c.l.b16 %v507_v8  ;;  %v556_v20 = vunpack.c.l.b16 %v508_v9  ;;  %v557_v21 = vunpack.c.l.b16 %v509_v10 }
  0x48   : > { %v607_v19 = vsel %vm574_vm6, %v606_v0, %v605_v15  ;;  %v558_v22 = vrot.slane %v551_v13, 7  ;;  %v561_v25 = vrot.slane %v552_v14, 6  ;;  %v564_v26 = vrot.slane %v553_v16, 5 }
  0x49   : > { %v609_v23 = vsel %vm577_vm7, %v608_v1, %v607_v19  ;;  %v567_v27 = vrot.slane %v554_v17, 4  ;;  %v570_v30 = vrot.slane %v555_v18, 3  ;;  %v573_v32 = vrot.slane %v556_v20, 2 }
  0x4a   : > { %v610_v28 = vpack.c.b16 %v609_v23, %v609_v23  ;;  %v560_v29 = vsel %vm559_vm0, %v558_v22, %v550_v12  ;;  %v576_v35 = vrot.slane %v557_v21, 1  ;;  %v535_v53 = vpack.c.bf16 %v527_v51, %v527_v51 }
  0x4b   : > { %v563_v31 = vsel %vm562_vm1, %v561_v25, %v560_v29  ;;  %v536_v57 = vpack.c.bf16 %v528_v52, %v528_v52  ;;  %v534_v61 = vpack.c.bf16 %v526_v54, %v526_v54  ;;  %v537_v62 = vpack.c.bf16 %v529_v55, %v529_v55  ;;  %v767_v29 = vld [vmem:[%s2067_s11 + $0x9] sm:$0x1]  ;;  %v749_v52 = vld [vmem:[%s2082_s12 + $0x1] sm:$0x1] }
  0x4c   : > { %v616_v33 = vsel %vm611_vm8, %v610_v28, 0  ;;  %v566_v34 = vsel %vm565_vm2, %v564_v26, %v563_v31  ;;  %v538_v63 = vpack.c.bf16 %v530_v56, %v530_v56  ;;  %v679_v0 = vunpack.c.l.b16 %v535_v53  ;;  %v766_v28 = vld [vmem:[%s2067_s11 + $0x5] sm:$0x1]  ;;  %v765_v31 = vld [vmem:[%s2067_s11 + $0x1] sm:$0x1] }
  0x4d   : > { %1741 = vmatpush3.bf16.xpose.msra.mxu0 %v616_v33  ;;  %v569_v36 = vsel %vm568_vm3, %v567_v27, %v566_v34  ;;  %v539_v1 = vpack.c.bf16 %v531_v58, %v531_v58  ;;  %v540_v2 = vpack.c.bf16 %v532_v59, %v532_v59  ;;  %v541_v3 = vpack.c.bf16 %v533_v60, %v533_v60  ;;  %v752_v56 = vld [vmem:[%s2082_s12 + $0xd] sm:$0x1]  ;;  %v772_v58 = vld [vmem:[%s2067_s11 + $0x1d] sm:$0x1] }
  0x4e   : > { %v572_v37 = vsel %vm571_vm4, %v570_v30, %v569_v36  ;;  %1758 = vmatprep.subr.bf16.mxu0 %v1943_v24  ;;  %v680_v4 = vunpack.c.l.b16 %v536_v57  ;;  %v678_v5 = vunpack.c.l.b16 %v534_v61  ;;  %v681_v6 = vunpack.c.l.b16 %v537_v62  ;;  %v769_v36 = vld [vmem:[%s2067_s11 + $0x11] sm:$0x1] }
  0x4f   : > { %v575_v38 = vsel %vm574_vm6, %v573_v32, %v572_v37  ;;  %v682_v7 = vunpack.c.l.b16 %v538_v63  ;;  %v686_v8 = vrot.slane %v679_v0, 7  ;;  %v683_v9 = vunpack.c.l.b16 %v539_v1  ;;  %v768_v32 = vld [vmem:[%s2067_s11 + $0xd] sm:$0x1]  ;;  %v1018_v63 = vld [vmem:[%s2067_s11 + $0x6] sm:$0x1] }
  0x50   : > { %v578_v39 = vsel %vm577_vm7, %v576_v35, %v575_v38  ;;  %v684_v10 = vunpack.c.l.b16 %v540_v2  ;;  %v685_v11 = vunpack.c.l.b16 %v541_v3  ;;  %v688_v12 = vrot.slane %v680_v4, 6  ;;  %v753_v1 = vld [vmem:[%s2082_s12 + $0x11] sm:$0x1] }
  0x51   : > { %v579_v40 = vpack.c.b16 %v578_v39, %v578_v39  ;;  %v687_v13 = vsel %vm559_vm0, %v686_v8, %v678_v5  ;;  %v690_v14 = vrot.slane %v681_v6, 5  ;;  %v692_v15 = vrot.slane %v682_v7, 4 }
  0x52   : > { %v689_v16 = vsel %vm562_vm1, %v688_v12, %v687_v13  ;;  %v694_v17 = vrot.slane %v683_v9, 3  ;;  %v696_v18 = vrot.slane %v684_v10, 2  ;;  %v698_v20 = vrot.slane %v685_v11, 1  ;;  %v1019_v9 = vld [vmem:[%s2067_s11 + $0xa] sm:$0x1] }
  0x53   : > { %v691_v19 = vsel %vm565_vm2, %v690_v14, %v689_v16  ;;  %vm704_vm9 = vcmask 1043456   ;;  %v774_v30 = vpack.c.bf16 %v766_v28, %v766_v28  ;;  %v775_v33 = vpack.c.bf16 %v767_v29, %v767_v29  ;;  %v754_v12 = vld [vmem:[%s2082_s12 + $0x15] sm:$0x1]  ;;  %v1017_v14 = vld [vmem:[%s2067_s11 + $0x2] sm:$0x1] }
  0x54   : > { %1743 = vmatmul.mubr.msk.bf16.vlgmr.msra.gmra.mxu0 %vm611_vm8, %v579_v40  ;;  %v693_v21 = vsel %vm568_vm3, %v692_v15, %v691_v19  ;;  %v773_v34 = vpack.c.bf16 %v765_v31, %v765_v31  ;;  %v776_v37 = vpack.c.bf16 %v768_v32, %v768_v32  ;;  %v757_v60 = vpack.c.bf16 %v749_v52, %v749_v52  ;;  %v755_v19 = vld [vmem:[%s2082_s12 + $0x19] sm:$0x1] }
  0x55   : > { %1760 = vmatprep.mubr.msk.bf16.mxu0 %vm1944_vm5, %v1943_v24  ;;  %v695_v22 = vsel %vm571_vm4, %v694_v17, %v693_v21  ;;  %v837_v35 = vunpack.c.l.b16 %v774_v30  ;;  %v838_v38 = vunpack.c.l.b16 %v775_v33  ;;  %v760_v2 = vpack.c.bf16 %v752_v56, %v752_v56  ;;  %v1020_v21 = vld [vmem:[%s2067_s11 + $0xe] sm:$0x1]  ;;  %v1021_v33 = vld [vmem:[%s2067_s11 + $0x12] sm:$0x1] }
  0x56   : > { %v697_v23 = vsel %vm574_vm6, %v696_v18, %v695_v22  ;;  %v836_v39 = vunpack.c.l.b16 %v773_v34  ;;  %v780_v3 = vpack.c.bf16 %v772_v58, %v772_v58  ;;  %v805_v7 = vunpack.c.l.b16 %v757_v60  ;;  %v1271_v60 = vld [vmem:[%s2067_s11 + $0xb] sm:$0x1] }
  0x57   : > { %v699_v25 = vsel %vm577_vm7, %v698_v20, %v697_v23  ;;  %v844_v40 = vrot.slane %v837_v35, 7  ;;  %v1026_v10 = vpack.c.bf16 %v1018_v63, %v1018_v63  ;;  %v761_v13 = vpack.c.bf16 %v753_v1, %v753_v1  ;;  %v756_v23 = vld [vmem:[%s2082_s12 + $0x1d] sm:$0x1]  ;;  %v1269_v1 = vld [vmem:[%s2067_s11 + $0x3] sm:$0x1] }
  0x58   : > { %v700_v26 = vpack.c.b16 %v699_v25, %v699_v25  ;;  %v808_v16 = vunpack.c.l.b16 %v760_v2  ;;  %v843_v17 = vunpack.c.l.b16 %v780_v3  ;;  %v1027_v22 = vpack.c.bf16 %v1019_v9, %v1019_v9 }
  0x59   : > { %v845_v51 = vsel %vm559_vm0, %v844_v40, %v836_v39  ;;  %v762_v25 = vpack.c.bf16 %v754_v12, %v754_v12  ;;  %v1089_v28 = vunpack.c.l.b16 %v1026_v10  ;;  %v809_v30 = vunpack.c.l.b16 %v761_v13  ;;  %v1001_v10 = vld [vmem:[%s2082_s12 + $0x2] sm:$0x1] }
  0x5a   : > { %v706_v27 = vsel %vm704_vm9, %v700_v26, 0  ;;  %v763_v31 = vpack.c.bf16 %v755_v19, %v755_v19  ;;  %v817_v32 = vrot.slane %v808_v16, 5  ;;  %v1028_v34 = vpack.c.bf16 %v1020_v21, %v1020_v21 }
  0x5b   : > { %1747 = vmatpush3.bf16.msra.mxu1 %v706_v27  ;;  %v1025_v27 = vpack.c.bf16 %v1017_v14, %v1017_v14  ;;  %v856_v35 = vrot.slane %v843_v17, 1  ;;  %v810_v40 = vunpack.c.l.b16 %v762_v25  ;;  %v1279_v12 = vpack.c.bf16 %v1271_v60, %v1271_v60  ;;  %v1275_v60 = vld [vmem:[%s2067_s11 + $0x1b] sm:$0x1] }
  0x5c   : > { %1752 = vmatprep.subr.bf16.mxu1 %v1943_v24  ;;  %v1277_v16 = vpack.c.bf16 %v1269_v1, %v1269_v1 }
  0x5d   : > { %v821_v56 = vrot.slane %v810_v40, 3 }
 0x114   : > { %v652_v41 = vpop.f32.mrf.mxu0 }
 0x115   : > { %v658_v42 = vsel %vm611_vm8, %v652_v41, -inf }
 0x116   : > { %659 = vmax.xlane.f32.xlu0 %v658_v42  ;;  %v1744_v43 = vpop.f32.mrf.mxu0  ;;  %v770_v42 = vld [vmem:[%s2067_s11 + $0x15] sm:$0x1] }
 0x117   : > { %v777_v43 = vpack.c.bf16 %v769_v36, %v769_v36  ;;  %v764_v36 = vpack.c.bf16 %v756_v23, %v756_v23  ;;  %v1009_v23 = vpack.c.bf16 %v1001_v10, %v1001_v10 }
 0x118   : > { %v655_v44 = vpop.f32.mrf.mxu0 }
 0x119   : > { %v839_v44 = vunpack.c.l.b16 %v776_v37  ;;  %v840_v53 = vunpack.c.l.b16 %v777_v43  ;;  %v819_v43 = vrot.slane %v809_v30, 4 }
 0x11a   : > { %v1745_v45 = vpop.f32.mrf.mxu0 }
 0x11b   : > { %v771_v45 = vld [vmem:[%s2067_s11 + $0x19] sm:$0x1]  ;;  %v848_v55 = vrot.slane %v839_v44, 5  ;;  %v850_v0 = vrot.slane %v840_v53, 4  ;;  %v1022_v44 = vld [vmem:[%s2067_s11 + $0x16] sm:$0x1]  ;;  %v2170_v53 = vunpack.c.l.b16 %v764_v36 }
 0x11c   : > { %v779_v54 = vpack.c.bf16 %v771_v45, %v771_v45  ;;  %v1029_v45 = vpack.c.bf16 %v1021_v33, %v1021_v33  ;;  %v1030_v58 = vpack.c.bf16 %v1022_v44, %v1022_v44 }
 0x11e   : > { %v842_v4 = vunpack.c.l.b16 %v779_v54 }
 0x120   : > { %v854_v18 = vrot.slane %v842_v4, 2 }
 0x19f   : > { %v660_v46 = vpop.xlane.xlu0 %659 }
 0x1a0   : > { %v661_v47 = vsub.f32 %v652_v41, %v660_v46  ;;  %v750_v41 = vld [vmem:[%s2082_s12 + $0x5] sm:$0x1]  ;;  %v846_v46 = vrot.slane %v838_v38, 6  ;;  %v1090_v38 = vunpack.c.l.b16 %v1027_v22 }
 0x1a2   : > { %v662_v48 = vmul.f32 1.442695, %v661_v47  ;;  %v751_v47 = vld [vmem:[%s2082_s12 + $0x9] sm:$0x1]  ;;  %v847_v59 = vsel %vm562_vm1, %v846_v46, %v845_v51  ;;  %v1270_v46 = vld [vmem:[%s2067_s11 + $0x7] sm:$0x1]  ;;  %v1091_v51 = vunpack.c.l.b16 %v1028_v34 }
 0x1a3   : > { %v759_v57 = vpack.c.bf16 %v751_v47, %v751_v47  ;;  %v849_v5 = vsel %vm565_vm2, %v848_v55, %v847_v59  ;;  %v811_v47 = vunpack.c.l.b16 %v763_v31  ;;  %v1098_v54 = vrot.slane %v1090_v38, 6  ;;  %v1002_v55 = vld [vmem:[%s2082_s12 + $0x6] sm:$0x1]  ;;  %v1005_v34 = vld [vmem:[%s2082_s12 + $0x12] sm:$0x1] }
 0x1a4   : > { %1849 = vpow2.f32 %v662_v48  ;;  %v758_v48 = vpack.c.bf16 %v750_v41, %v750_v41  ;;  %v851_v15 = vsel %vm568_vm3, %v850_v0, %v849_v5  ;;  %v1088_v41 = vunpack.c.l.b16 %v1025_v27  ;;  %v1003_v5 = vld [vmem:[%s2082_s12 + $0xa] sm:$0x1] }
 0x1a5   : > { %v807_v6 = vunpack.c.l.b16 %v759_v57  ;;  %v1024_v57 = vld [vmem:[%s2067_s11 + $0x1e] sm:$0x1]  ;;  %v1092_v0 = vunpack.c.l.b16 %v1029_v45  ;;  %v823_v3 = vrot.slane %v811_v47, 2  ;;  %v1100_v4 = vrot.slane %v1091_v51, 5 }
 0x1a6   : > { %v806_v61 = vunpack.c.l.b16 %v758_v48  ;;  %v1011_v21 = vpack.c.bf16 %v1003_v5, %v1003_v5  ;;  %v1342_v31 = vunpack.c.l.b16 %v1279_v12  ;;  %v1057_v45 = vunpack.c.l.b16 %v1009_v23 }
 0x1a7   : > { %v815_v20 = vrot.slane %v807_v6, 6  ;;  %v1010_v6 = vpack.c.bf16 %v1002_v55, %v1002_v55  ;;  %v1102_v19 = vrot.slane %v1092_v0, 4  ;;  %v1283_v12 = vpack.c.bf16 %v1275_v60, %v1275_v60 }
 0x1a8   : > { %v813_v8 = vrot.slane %v806_v61, 7  ;;  %v1278_v61 = vpack.c.bf16 %v1270_v46, %v1270_v46  ;;  %v1350_v55 = vrot.slane %v1342_v31, 6 }
 0x1a9   : > { %v1058_v25 = vunpack.c.l.b16 %v1010_v6 }
 0x1aa   : > { %v814_v26 = vsel %vm559_vm0, %v813_v8, %v805_v7  ;;  %v825_v7 = vrot.slane %v2170_v53, 1  ;;  %v1032_v8 = vpack.c.bf16 %v1024_v57, %v1024_v57  ;;  %v1341_v17 = vunpack.c.l.b16 %v1278_v61  ;;  %v1008_v57 = vld [vmem:[%s2082_s12 + $0x1e] sm:$0x1] }
 0x1ab   : > { %v816_v37 = vsel %vm562_vm1, %v815_v20, %v814_v26  ;;  %v1004_v20 = vld [vmem:[%s2082_s12 + $0xe] sm:$0x1]  ;;  %v1273_v26 = vld [vmem:[%s2067_s11 + $0x13] sm:$0x1]  ;;  %v1065_v46 = vrot.slane %v1058_v25, 7 }
 0x1ac   : > { %v818_v48 = vsel %vm565_vm2, %v817_v32, %v816_v37  ;;  %v2195_v30 = vunpack.c.l.b16 %v1032_v8  ;;  %v1254_v32 = vld [vmem:[%s2082_s12 + $0x7] sm:$0x1]  ;;  %v1012_v36 = vpack.c.bf16 %v1004_v20, %v1004_v20  ;;  %v1340_v37 = vunpack.c.l.b16 %v1277_v16 }
 0x1ad   : > { %v1348_v38 = vrot.slane %v1341_v17, 7  ;;  %v1281_v44 = vpack.c.bf16 %v1273_v26, %v1273_v26  ;;  %v1257_v17 = vld [vmem:[%s2082_s12 + $0x13] sm:$0x1] }
 0x1ae   : > { %v1108_v51 = vrot.slane %v2195_v30, 1 }
 0x1af   : > { %v1344_v1 = vunpack.c.l.b16 %v1281_v44 }
 0x1b1   : > { %v2112_v49 = vpop.eup %1849 }
 0x1b2   : > { %v664_v50 = vsel %vm611_vm8, %v2112_v49, 0.0 }
 0x1b3   : > { %665 = vadd.xlane.f32.xlu0 %v664_v50  ;;  %v778_v50 = vpack.c.bf16 %v770_v42, %v770_v42  ;;  %v1096_v42 = vrot.slane %v1089_v28, 7 }
 0x1b5   : > { %v841_v62 = vunpack.c.l.b16 %v778_v50  ;;  %v1023_v50 = vld [vmem:[%s2067_s11 + $0x1a] sm:$0x1]  ;;  %v1097_v59 = vsel %vm559_vm0, %v1096_v42, %v1088_v41  ;;  %v1059_v42 = vunpack.c.l.b16 %v1011_v21  ;;  %v1354_v21 = vrot.slane %v1344_v1, 4 }
 0x1b6   : > { %v1031_v63 = vpack.c.bf16 %v1023_v50, %v1023_v50  ;;  %v1099_v9 = vsel %vm562_vm1, %v1098_v54, %v1097_v59  ;;  %v1007_v41 = vld [vmem:[%s2082_s12 + $0x1a] sm:$0x1]  ;;  %v1262_v50 = vpack.c.bf16 %v1254_v32, %v1254_v32  ;;  %v1060_v59 = vunpack.c.l.b16 %v1012_v36 }
 0x1b7   : > { %v852_v11 = vrot.slane %v841_v62, 3  ;;  %v820_v62 = vsel %vm568_vm3, %v819_v43, %v818_v48  ;;  %v1101_v22 = vsel %vm565_vm2, %v1100_v4, %v1099_v9  ;;  %v1274_v43 = vld [vmem:[%s2067_s11 + $0x17] sm:$0x1]  ;;  %v1255_v48 = vld [vmem:[%s2082_s12 + $0xb] sm:$0x1]  ;;  %v1067_v0 = vrot.slane %v1059_v42, 6 }
 0x1b8   : > { %v822_v14 = vsel %vm571_vm4, %v821_v56, %v820_v62  ;;  %v1253_v56 = vld [vmem:[%s2082_s12 + $0x3] sm:$0x1]  ;;  %v1282_v61 = vpack.c.bf16 %v1274_v43, %v1274_v43  ;;  %v1349_v62 = vsel %vm559_vm0, %v1348_v38, %v1340_v37  ;;  %v1066_v4 = vsel %vm559_vm0, %v1065_v46, %v1057_v45  ;;  %v1259_v45 = vld [vmem:[%s2082_s12 + $0x1b] sm:$0x1] }
 0x1b9   : > { %v853_v29 = vsel %vm571_vm4, %v852_v11, %v851_v15  ;;  %v1272_v11 = vld [vmem:[%s2067_s11 + $0xf] sm:$0x1]  ;;  %v1093_v15 = vunpack.c.l.b16 %v1030_v58  ;;  %v1015_v58 = vpack.c.bf16 %v1007_v41, %v1007_v41  ;;  %v1261_v6 = vpack.c.bf16 %v1253_v56, %v1253_v56 }
 0x1ba   : > { %v855_v39 = vsel %vm574_vm6, %v854_v18, %v853_v29  ;;  %v2184_v18 = vunpack.c.l.b16 %v1031_v63  ;;  %v1280_v27 = vpack.c.bf16 %v1272_v11, %v1272_v11  ;;  %v2193_v29 = vsel %vm574_vm6, %v823_v3, %v822_v14  ;;  %v1276_v11 = vld [vmem:[%s2067_s11 + $0x1f] sm:$0x1]  ;;  %s1530_s11 = scalar_lea.hbm %s2397_s4, %s1721_s7 }
 0x1bb   : > { %v857_v52 = vsel %vm577_vm7, %v856_v35, %v855_v39  ;;  %v1104_v33 = vrot.slane %v1093_v15, 3  ;;  %v1006_v35 = vld [vmem:[%s2082_s12 + $0x16] sm:$0x1]  ;;  %v1103_v39 = vsel %vm568_vm3, %v1102_v19, %v1101_v22  ;;  %v1263_v3 = vpack.c.bf16 %v1255_v48, %v1255_v48 }
 0x1bc   : > { %v858_v2 = vpack.c.b16 %v857_v52, %v857_v52  ;;  %v1106_v40 = vrot.slane %v2184_v18, 2  ;;  %v1343_v47 = vunpack.c.l.b16 %v1280_v27  ;;  %v1013_v52 = vpack.c.bf16 %v1005_v34, %v1005_v34  ;;  %v1258_v34 = vld [vmem:[%s2082_s12 + $0x17] sm:$0x1] }
 0x1bd   : > { %v1014_v54 = vpack.c.bf16 %v1006_v35, %v1006_v35  ;;  %v1105_v63 = vsel %vm571_vm4, %v1104_v33, %v1103_v39  ;;  %v1310_v8 = vunpack.c.l.b16 %v1262_v50  ;;  %v1016_v9 = vpack.c.bf16 %v1008_v57, %v1008_v57 }
 0x1be   : > { %v2190_v28 = vsel %vm611_vm8, %v858_v2, 0  ;;  %v1256_v2 = vld [vmem:[%s2082_s12 + $0xf] sm:$0x1]  ;;  %v1352_v5 = vrot.slane %v1343_v47, 5  ;;  %v1061_v10 = vunpack.c.l.b16 %v1013_v52  ;;  %v1069_v15 = vrot.slane %v1060_v59, 5 }
 0x1bf   : > { %v1062_v14 = vunpack.c.l.b16 %v1014_v54  ;;  %v1345_v16 = vunpack.c.l.b16 %v1282_v61  ;;  %v1264_v18 = vpack.c.bf16 %v1256_v2, %v1256_v2  ;;  %v1107_v19 = vsel %vm574_vm6, %v1106_v40, %v1105_v63  ;;  %v1260_v59 = vld [vmem:[%s2082_s12 + $0x1f] sm:$0x1]  ;;  %s1515_s12 = scalar_lea.sflag [#allocation6], %s2059_s25 }
 0x1c0   : > { %v1068_v20 = vsel %vm562_vm1, %v1067_v0, %v1066_v4  ;;  %v1311_v22 = vunpack.c.l.b16 %v1263_v3  ;;  %v1284_v25 = vpack.c.bf16 %v1276_v11, %v1276_v11  ;;  %v1309_v27 = vunpack.c.l.b16 %v1261_v6 }
 0x1c1   : > { %v1317_v30 = vrot.slane %v1310_v8, 7  ;;  %v1071_v32 = vrot.slane %v1061_v10, 4  ;;  %v1346_v33 = vunpack.c.l.b16 %v1283_v12  ;;  %v1265_v35 = vpack.c.bf16 %v1257_v17, %v1257_v17 }
 0x1c2   : > { %v1063_v36 = vunpack.c.l.b16 %v1015_v58  ;;  %v1070_v37 = vsel %vm565_vm2, %v1069_v15, %v1068_v20  ;;  %v1356_v38 = vrot.slane %v1345_v16, 3  ;;  %v1312_v39 = vunpack.c.l.b16 %v1264_v18 }
 0x1c3   : > { %v1109_v41 = vsel %vm577_vm7, %v1108_v51, %v1107_v19  ;;  %v1319_v43 = vrot.slane %v1311_v22, 6  ;;  %v1073_v44 = vrot.slane %v1062_v14, 3  ;;  %v1266_v46 = vpack.c.bf16 %v1258_v34, %v1258_v34 }
 0x1c4   : > { %v1318_v47 = vsel %vm559_vm0, %v1317_v30, %v1309_v27  ;;  %v1072_v48 = vsel %vm568_vm3, %v1071_v32, %v1070_v37  ;;  %v1358_v50 = vrot.slane %v1346_v33, 2  ;;  %v1313_v52 = vunpack.c.l.b16 %v1265_v35 }
 0x1c5   : > { %v826_v51 = vsel %vm577_vm7, %v825_v7, %v2193_v29  ;;  %v1064_v54 = vunpack.c.l.b16 %v1016_v9  ;;  %v1321_v56 = vrot.slane %v1312_v39, 5  ;;  %v1110_v57 = vpack.c.b16 %v1109_v41, %v1109_v41 }
 0x1c6   : > { %v1075_v58 = vrot.slane %v1063_v36, 2  ;;  %v1267_v60 = vpack.c.bf16 %v1259_v45, %v1259_v45  ;;  %v1074_v61 = vsel %vm571_vm4, %v1073_v44, %v1072_v48  ;;  %v1314_v63 = vunpack.c.l.b16 %v1266_v46 }
 0x1c7   : > { %v827_v0 = vpack.c.b16 %v826_v51, %v826_v51  ;;  %v1323_v7 = vrot.slane %v1313_v52, 4  ;;  %v1077_v29 = vrot.slane %v1064_v54, 1  ;;  %v1268_v1 = vpack.c.bf16 %v1260_v59, %v1260_v59  ;;  %v783_v59 = vld [vmem:[%s2117_s13 + $0x9] sm:$0x1] }
 0x1c8   : > { %v1115_v3 = vsel %vm611_vm8, %v1110_v57, 0  ;;  %v1076_v4 = vsel %vm574_vm6, %v1075_v58, %v1074_v61  ;;  %v1325_v8 = vrot.slane %v1314_v63, 3  ;;  %v782_v58 = vld [vmem:[%s2117_s13 + $0x5] sm:$0x1]  ;;  %v784_v61 = vld [vmem:[%s2117_s13 + $0xd] sm:$0x1] }
 0x1c9   : > { %v1078_v10 = vsel %vm577_vm7, %v1077_v29, %v1076_v4  ;;  %v1316_v11 = vunpack.c.l.b16 %v1268_v1  ;;  %v785_v63 = vld [vmem:[%s2117_s13 + $0x11] sm:$0x1]  ;;  %v786_v29 = vld [vmem:[%s2117_s13 + $0x15] sm:$0x1] }
 0x1ca   : > { %v1079_v15 = vpack.c.b16 %v1078_v10, %v1078_v10  ;;  %v793_v1 = vpack.c.bf16 %v785_v63, %v785_v63  ;;  %v794_v4 = vpack.c.bf16 %v786_v29, %v786_v29  ;;  %v788_v10 = vld [vmem:[%s2117_s13 + $0x1d] sm:$0x1] }
 0x1cb   : > { %v1329_v16 = vrot.slane %v1316_v11, 1 }
 0x23c   : > { %v666_v13 = vpop.xlane.xlu0 %665 }
 0x23d   : > { %1851 = vrcp.f32 %v666_v13  ;;  %v1351_v13 = vsel %vm562_vm1, %v1350_v55, %v1349_v62 }
 0x23e   : > { %v1353_v26 = vsel %vm565_vm2, %v1352_v5, %v1351_v13  ;;  %v1315_v5 = vunpack.c.l.b16 %v1267_v60  ;;  %v790_v60 = vpack.c.bf16 %v782_v58, %v782_v58  ;;  %v1285_v58 = vld [vmem:[%s2117_s13 + $0x3] sm:$0x1] }
 0x23f   : > { %v1355_v42 = vsel %vm568_vm3, %v1354_v21, %v1353_v26 }
 0x240   : > { %v1357_v55 = vsel %vm571_vm4, %v1356_v38, %v1355_v42  ;;  %v1327_v13 = vrot.slane %v1315_v5, 2 }
 0x241   : > { %v1359_v53 = vsel %vm574_vm6, %v1358_v50, %v1357_v55 }
 0x24a   : > { %v1852_v23 = vpop.eup %1851 }
 0x24b   : > { %v2220_v31 = vmul.f32 %v1852_v23, %v2112_v49  ;;  %v1347_v49 = vunpack.c.l.b16 %v1284_v25 }
 0x24d   : > { %v669_v40 = vpack.c.bf16 %v2220_v31, %v2220_v31  ;;  %v1360_v62 = vrot.slane %v1347_v49, 1 }
 0x24f   : > { %1749 = vmatmul.mubr.msk.bf16.vlgmr.msra.gmra.mxu1 %vm611_vm8, %v669_v40  ;;  %v1361_v6 = vsel %vm577_vm7, %v1360_v62, %v1359_v53  ;;  %v791_v62 = vpack.c.bf16 %v783_v59, %v783_v59  ;;  %v792_v53 = vpack.c.bf16 %v784_v61, %v784_v61 }
 0x250   : > { %1753 = vmatpush3.bf16.xpose.msra.mxu1 %v2190_v28  ;;  %1754 = vmatprep.mubr.msk.bf16.mxu1 %vm1944_vm5, %v1943_v24  ;;  %v1320_v28 = vsel %vm562_vm1, %v1319_v43, %v1318_v47  ;;  %v1362_v12 = vpack.c.b16 %v1361_v6, %v1361_v6 }
 0x251   : > { %1764 = vmatprep.subr.bf16.mxu1 %v1943_v24  ;;  %v1322_v2 = vsel %vm565_vm2, %v1321_v56, %v1320_v28  ;;  %v781_v28 = vld [vmem:[%s2117_s13 + $0x1] sm:$0x1]  ;;  %v928_v6 = vunpack.c.l.b16 %v792_v53  ;;  %v1293_v53 = vpack.c.bf16 %v1285_v58, %v1285_v58 }
 0x252   : > { %v1324_v9 = vsel %vm568_vm3, %v1323_v7, %v1322_v2  ;;  %v1367_v17 = vsel %vm611_vm8, %v1362_v12, 0  ;;  %v926_v7 = vunpack.c.l.b16 %v790_v60  ;;  %v927_v2 = vunpack.c.l.b16 %v791_v62  ;;  %v1039_v62 = vld [vmem:[%s2117_s13 + $0x1a] sm:$0x1] }
 0x253   : > { %v1326_v14 = vsel %vm571_vm4, %v1325_v8, %v1324_v9  ;;  %v929_v12 = vunpack.c.l.b16 %v793_v1 }
 0x254   : > { %v1328_v18 = vsel %vm574_vm6, %v1327_v13, %v1326_v14  ;;  %v933_v8 = vrot.slane %v926_v7, 7  ;;  %v935_v13 = vrot.slane %v927_v2, 6  ;;  %v1289_v2 = vld [vmem:[%s2117_s13 + $0x13] sm:$0x1] }
 0x255   : > { %v1330_v19 = vsel %vm577_vm7, %v1329_v16, %v1328_v18  ;;  %v930_v16 = vunpack.c.l.b16 %v794_v4  ;;  %v1040_v4 = vld [vmem:[%s2117_s13 + $0x1e] sm:$0x1] }
 0x256   : > { %v1331_v20 = vpack.c.b16 %v1330_v19, %v1330_v19 }
 0x257   : > { %1755 = vmatmul.mubr.msk.bf16.vlgmr.msra.gmra.mxu1 %vm611_vm8, %v827_v0  ;;  %v789_v0 = vpack.c.bf16 %v781_v28, %v781_v28  ;;  %v1288_v28 = vld [vmem:[%s2117_s13 + $0xf] sm:$0x1] }
 0x258   : > { %1765 = vmatpush3.bf16.xpose.msra.mxu1 %v1115_v3  ;;  %1766 = vmatprep.mubr.msk.bf16.mxu1 %vm1944_vm5, %v1943_v24  ;;  %v787_v3 = vld [vmem:[%s2117_s13 + $0x19] sm:$0x1] }
 0x259   : > { %1776 = vmatprep.subr.bf16.mxu1 %v1943_v24  ;;  %v925_v5 = vunpack.c.l.b16 %v789_v0  ;;  %v795_v11 = vpack.c.bf16 %v787_v3, %v787_v3  ;;  %v1296_v3 = vpack.c.bf16 %v1288_v28, %v1288_v28 }
 0x25b   : > { %v931_v18 = vunpack.c.l.b16 %v795_v11  ;;  %v1429_v11 = vunpack.c.l.b16 %v1293_v53 }
 0x25f   : > { %1767 = vmatmul.mubr.msk.bf16.vlgmr.msra.gmra.mxu1 %vm611_vm8, %v1079_v15  ;;  %v796_v15 = vpack.c.bf16 %v788_v10, %v788_v10 }
 0x260   : > { %1777 = vmatpush3.bf16.xpose.msra.mxu1 %v1367_v17  ;;  %1778 = vmatprep.mubr.msk.bf16.mxu1 %vm1944_vm5, %v1943_v24  ;;  %v934_v17 = vsel %vm559_vm0, %v933_v8, %v925_v5  ;;  %v1047_v5 = vpack.c.bf16 %v1039_v62, %v1039_v62 }
 0x261   : > { %v936_v19 = vsel %vm562_vm1, %v935_v13, %v934_v17 }
 0x267   : > { %1779 = vmatmul.mubr.msk.bf16.vlgmr.msra.gmra.mxu1 %vm611_vm8, %v1331_v20  ;;  %v937_v20 = vrot.slane %v928_v6, 5 }
 0x30f   : > { %v742_v21 = vpop.f32.mrf.mxu1 }
 0x310   : > { %748 = vst.msk [vmem:[%s2268_s27] sm:$0xff] %vm611_vm8, %v742_v21  ;;  %v939_v21 = vrot.slane %v929_v12, 4 }
 0x311   : > { %v1750_v22 = vpop.f32.mrf.mxu1 }
 0x312   : > { %v932_v22 = vunpack.c.l.b16 %v796_v15  ;;  %v1297_v15 = vpack.c.bf16 %v1289_v2, %v1289_v2 }
 0x313   : > { %v745_v23 = vpop.f32.mrf.mxu1 }
 0x314   : > { %v941_v23 = vrot.slane %v930_v16, 3  ;;  %v1048_v16 = vpack.c.bf16 %v1040_v4, %v1040_v4 }
 0x315   : > { %v1751_v25 = vpop.f32.mrf.mxu1 }
 0x316   : > { %v938_v25 = vsel %vm565_vm2, %v937_v20, %v936_v19  ;;  %v1183_v19 = vunpack.c.l.b16 %v1047_v5 }
 0x317   : > { %v899_v26 = vpop.f32.mrf.mxu1 }
 0x318   : > { %v905_v27 = vsel %vm611_vm8, %v899_v26, -inf }
 0x319   : > { %906 = vmax.xlane.f32.xlu1 %v905_v27  ;;  %v1756_v30 = vpop.f32.mrf.mxu1  ;;  %v940_v27 = vsel %vm568_vm3, %v939_v21, %v938_v25 }
 0x31a   : > { %v945_v30 = vrot.slane %v932_v22, 1 }
 0x31b   : > { %v902_v32 = vpop.f32.mrf.mxu1 }
 0x31c   : > { %v942_v32 = vsel %vm571_vm4, %v941_v23, %v940_v27  ;;  %v1291_v23 = vld [vmem:[%s2117_s13 + $0x1b] sm:$0x1] }
 0x31d   : > { %v1757_v33 = vpop.f32.mrf.mxu1 }
 0x31f   : > { %v1151_v34 = vpop.f32.mrf.mxu1 }
 0x320   : > { %v1157_v35 = vsel %vm611_vm8, %v1151_v34, -inf }
 0x321   : > { %1158 = vmax.xlane.f32.xlu1 %v1157_v35  ;;  %v1768_v36 = vpop.f32.mrf.mxu1 }
 0x323   : > { %v1154_v37 = vpop.f32.mrf.mxu1 }
 0x324   : > { %v1034_v37 = vld [vmem:[%s2117_s13 + $0x6] sm:$0x1] }
 0x325   : > { %v1769_v38 = vpop.f32.mrf.mxu1 }
 0x326   : > { %v1035_v38 = vld [vmem:[%s2117_s13 + $0xa] sm:$0x1] }
 0x327   : > { %v1403_v39 = vpop.f32.mrf.mxu1 }
 0x328   : > { %v1409_v40 = vsel %vm611_vm8, %v1403_v39, -inf }
 0x329   : > { %1410 = vmax.xlane.f32.xlu0 %v1409_v40  ;;  %v1780_v41 = vpop.f32.mrf.mxu1  ;;  %v1033_v40 = vld [vmem:[%s2117_s13 + $0x2] sm:$0x1] }
 0x32a   : > { %v1036_v41 = vld [vmem:[%s2117_s13 + $0xe] sm:$0x1] }
 0x32b   : > { %v1406_v42 = vpop.f32.mrf.mxu1 }
 0x32c   : > { %v1043_v42 = vpack.c.bf16 %v1035_v38, %v1035_v38 }
 0x32d   : > { %v1781_v43 = vpop.f32.mrf.mxu1 }
 0x32e   : > { %v1041_v43 = vpack.c.bf16 %v1033_v40, %v1033_v40 }
 0x3a2   : > { %v907_v44 = vpop.xlane.xlu1 %906 }
 0x3a3   : > { %v908_v49 = vsub.f32 %v899_v26, %v907_v44  ;;  %v943_v26 = vrot.slane %v931_v18, 2  ;;  %v1432_v18 = vunpack.c.l.b16 %v1296_v3 }
 0x3a5   : > { %v909_v45 = vmul.f32 1.442695, %v908_v49  ;;  %v944_v33 = vsel %vm574_vm6, %v943_v26, %v942_v32  ;;  %v1286_v49 = vld [vmem:[%s2117_s13 + $0x7] sm:$0x1]  ;;  %v1184_v32 = vunpack.c.l.b16 %v1048_v16 }
 0x3a7   : > { %1853 = vpow2.f32 %v909_v45  ;;  %v1037_v45 = vld [vmem:[%s2117_s13 + $0x12] sm:$0x1] }
 0x3aa   : > { %v1159_v46 = vpop.xlane.xlu1 %1158 }
 0x3ab   : > { %v1160_v47 = vsub.f32 %v1151_v34, %v1159_v46  ;;  %v946_v34 = vsel %vm577_vm7, %v945_v30, %v944_v33  ;;  %v1044_v46 = vpack.c.bf16 %v1036_v41, %v1036_v41  ;;  %v1433_v30 = vunpack.c.l.b16 %v1297_v15 }
 0x3ac   : > { %v947_v35 = vpack.c.b16 %v946_v34, %v946_v34  ;;  %v1441_v33 = vrot.slane %v1432_v18, 5  ;;  %v1195_v34 = vrot.slane %v1183_v19, 2  ;;  %v1197_v41 = vrot.slane %v1184_v32, 1 }
 0x3ad   : > { %v1161_v48 = vmul.f32 1.442695, %v1160_v47  ;;  %v1179_v47 = vunpack.c.l.b16 %v1043_v42  ;;  %v1180_v59 = vunpack.c.l.b16 %v1044_v46  ;;  %v1443_v40 = vrot.slane %v1433_v30, 4 }
 0x3ae   : > { %v952_v36 = vsel %vm704_vm9, %v947_v35, 0  ;;  %v1292_v35 = vld [vmem:[%s2117_s13 + $0x1f] sm:$0x1] }
 0x3af   : > { %1855 = vpow2.f32 %v1161_v48  ;;  %1759 = vmatpush3.bf16.msra.mxu0 %v952_v36  ;;  %v1177_v48 = vunpack.c.l.b16 %v1041_v43  ;;  %v1187_v60 = vrot.slane %v1179_v47, 6  ;;  %v1189_v1 = vrot.slane %v1180_v59, 5 }
 0x3b0   : > { %1770 = vmatprep.subr.bf16.mxu0 %v1943_v24  ;;  %v1299_v36 = vpack.c.bf16 %v1291_v23, %v1291_v23  ;;  %v1300_v42 = vpack.c.bf16 %v1292_v35, %v1292_v35 }
 0x3b2   : > { %v1411_v50 = vpop.xlane.xlu0 %1410 }
 0x3b3   : > { %v1412_v52 = vsub.f32 %v1403_v39, %v1411_v50  ;;  %v1042_v39 = vpack.c.bf16 %v1034_v37, %v1034_v37 }
 0x3b4   : > { %v2275_v51 = vpop.eup %1853 }
 0x3b5   : > { %v1413_v54 = vmul.f32 1.442695, %v1412_v52  ;;  %v911_v55 = vsel %vm611_vm8, %v2275_v51, 0.0  ;;  %v1178_v44 = vunpack.c.l.b16 %v1042_v39  ;;  %v1287_v52 = vld [vmem:[%s2117_s13 + $0xb] sm:$0x1] }
 0x3b6   : > { %912 = vadd.xlane.f32.xlu1 %v911_v55  ;;  %v1038_v55 = vld [vmem:[%s2117_s13 + $0x16] sm:$0x1]  ;;  %v1295_v61 = vpack.c.bf16 %v1287_v52, %v1287_v52 }
 0x3b7   : > { %1857 = vpow2.f32 %v1413_v54  ;;  %v1185_v50 = vrot.slane %v1178_v44, 7  ;;  %v1294_v54 = vpack.c.bf16 %v1286_v49, %v1286_v49  ;;  %v1046_v63 = vpack.c.bf16 %v1038_v55, %v1038_v55 }
 0x3b8   : > { %v1431_v8 = vunpack.c.l.b16 %v1295_v61  ;;  %v1435_v49 = vunpack.c.l.b16 %v1299_v36 }
 0x3b9   : > { %v1186_v0 = vsel %vm559_vm0, %v1185_v50, %v1177_v48  ;;  %v1430_v7 = vunpack.c.l.b16 %v1294_v54  ;;  %v1182_v10 = vunpack.c.l.b16 %v1046_v63  ;;  %v1436_v50 = vunpack.c.l.b16 %v1300_v42 }
 0x3ba   : > { %v1188_v6 = vsel %vm562_vm1, %v1187_v60, %v1186_v0  ;;  %v1439_v20 = vrot.slane %v1431_v8, 6  ;;  %v1447_v52 = vrot.slane %v1435_v49, 2 }
 0x3bb   : > { %v1437_v12 = vrot.slane %v1430_v7, 7  ;;  %v1190_v17 = vsel %vm565_vm2, %v1189_v1, %v1188_v6  ;;  %v1193_v22 = vrot.slane %v1182_v10, 3  ;;  %v1449_v58 = vrot.slane %v1436_v50, 1 }
 0x3bc   : > { %v2279_v56 = vpop.eup %1855 }
 0x3bd   : > { %v1163_v57 = vsel %vm611_vm8, %v2279_v56, 0.0  ;;  %v1438_v26 = vsel %vm559_vm0, %v1437_v12, %v1429_v11 }
 0x3be   : > { %1164 = vadd.xlane.f32.xlu0 %v1163_v57  ;;  %v1045_v57 = vpack.c.bf16 %v1037_v45, %v1037_v45  ;;  %v1440_v37 = vsel %vm562_vm1, %v1439_v20, %v1438_v26 }
 0x3bf   : > { %v1442_v43 = vsel %vm565_vm2, %v1441_v33, %v1440_v37 }
 0x3c0   : > { %v1181_v29 = vunpack.c.l.b16 %v1045_v57  ;;  %v1444_v47 = vsel %vm568_vm3, %v1443_v40, %v1442_v43 }
 0x3c2   : > { %v1191_v13 = vrot.slane %v1181_v29, 4 }
 0x3c4   : > { %v2290_v9 = vpop.eup %1857  ;;  %v1192_v27 = vsel %vm568_vm3, %v1191_v13, %v1190_v17 }
 0x3c5   : > { %v1415_v14 = vsel %vm611_vm8, %v2290_v9, 0.0  ;;  %v1194_v38 = vsel %vm571_vm4, %v1193_v22, %v1192_v27 }
 0x3c6   : > { %1416 = vadd.xlane.f32.xlu1 %v1415_v14  ;;  %v1290_v14 = vld [vmem:[%s2117_s13 + $0x17] sm:$0x1]  ;;  %v1196_v44 = vsel %vm574_vm6, %v1195_v34, %v1194_v38  ;;  %s1865_s13 = scalar_lea.vmem %s1533_s8, 128 }
 0x3c7   : > { %v1298_v25 = vpack.c.bf16 %v1290_v14, %v1290_v14  ;;  %v1198_v48 = vsel %vm577_vm7, %v1197_v41, %v1196_v44  ;;  %p1866_p1 = scmp.ne.s32.totalorder %s1533_s8, %s1865_s13  ;;  %p1873_p6 = scmp.lt.s32.totalorder %s1871_s22, %s1865_s13 }
 0x3c8   : > { %v1199_v55 = vpack.c.b16 %v1198_v48, %v1198_v48 }
 0x3c9   : > { %v1434_v39 = vunpack.c.l.b16 %v1298_v25  ;;  %p1867_p2 = pnand %p1866_p1, %p2017_p5  ;;  %p1874_p7 = por %p1873_p6, %p1872_p4 }
 0x3ca   : > { %v1204_v62 = vsel %vm704_vm9, %v1199_v55, 0 }
 0x3cb   : > { %v1445_v46 = vrot.slane %v1434_v39, 3  ;;  %p1868_p3 = pneg %p1867_p2 }
 0x3cd   : > { %v1446_v54 = vsel %vm571_vm4, %v1445_v46, %v1444_v47  ;;  %p1875_p8 = pnand %p1874_p7, %p1868_p3 }
 0x3ce   : > { %v1448_v60 = vsel %vm574_vm6, %v1447_v52, %v1446_v54 }
 0x3cf   : > { %v1450_v63 = vsel %vm577_vm7, %v1449_v58, %v1448_v60 }
 0x3d0   : > { %v1451_v0 = vpack.c.b16 %v1450_v63, %v1450_v63 }
 0x3d2   : > { %v1456_v29 = vsel %vm704_vm9, %v1451_v0, 0 }
 0x43f   : > { %v913_v21 = vpop.xlane.xlu1 %912 }
 0x440   : > { %1859 = vrcp.f32 %v913_v21 }
 0x447   : > { %v1165_v45 = vpop.xlane.xlu0 %1164 }
 0x448   : > { %1861 = vrcp.f32 %v1165_v45 }
 0x44d   : > { %v1860_v57 = vpop.eup %1859 }
 0x44e   : > { %v915_v59 = vmul.f32 %v1860_v57, %v2275_v51 }
 0x44f   : > { %v1417_v28 = vpop.xlane.xlu1 %1416 }
 0x450   : > { %1863 = vrcp.f32 %v1417_v28  ;;  %v916_v61 = vpack.c.bf16 %v915_v59, %v915_v59  ;;  %v1000_v1 = vadd.f32 %v915_v59, %v2220_v31 }
 0x452   : > { %1761 = vmatmul.mubr.msk.bf16.vlgmr.msra.gmra.mxu0 %vm611_vm8, %v916_v61 }
 0x453   : > { %1771 = vmatpush3.bf16.msra.mxu0 %v1204_v62  ;;  %1772 = vmatprep.mubr.msk.bf16.mxu0 %vm1944_vm5, %v1943_v24 }
 0x454   : > { %1782 = vmatprep.subr.bf16.mxu0 %v1943_v24 }
 0x455   : > { %v1862_v51 = vpop.eup %1861 }
 0x456   : > { %v1167_v53 = vmul.f32 %v1862_v51, %v2279_v56 }
 0x458   : > { %v1168_v7 = vpack.c.bf16 %v1167_v53, %v1167_v53  ;;  %v1252_v4 = vadd.f32 %v1167_v53, %v1000_v1 }
 0x45a   : > { %1773 = vmatmul.mubr.msk.bf16.vlgmr.msra.gmra.mxu0 %vm611_vm8, %v1168_v7 }
 0x45b   : > { %1783 = vmatpush3.bf16.msra.mxu0 %v1456_v29  ;;  %1784 = vmatprep.mubr.msk.bf16.mxu0 %vm1944_vm5, %v1943_v24 }
 0x45d   : > { %v1864_v2 = vpop.eup %1863 }
 0x45e   : > { %v1419_v3 = vmul.f32 %v1864_v2, %v2290_v9 }
 0x460   : > { %v1420_v5 = vpack.c.bf16 %v1419_v3, %v1419_v3  ;;  %v1504_v56 = vadd.f32 %v1419_v3, %v1252_v4 }
 0x462   : > { %1785 = vmatmul.mubr.msk.bf16.vlgmr.msra.gmra.mxu0 %vm611_vm8, %v1420_v5  ;;  %v1505_v6 = vmul.f32 0.25, %v1504_v56 }
 0x464   : > { %1506 = vst.msk [vmem:[%s484_s5] sm:$0xff] %vm611_vm8, %v1505_v6 }
 0x512   : > { %v988_v8 = vpop.f32.mrf.mxu0 }
 0x513   : > { %995 = vrot.lane.b32.xlu0 %v988_v8, %s1945_s6 }
 0x514   : > { %v1762_v24 = vpop.f32.mrf.mxu0 }
 0x516   : > { %v991_v31 = vpop.f32.mrf.mxu0 }
 0x517   : > { %1878 = shalt.err (!%p1875_p8)
}
 0x518   : > { %s1879_s18 = scalar_lea.hbm %s1530_s11, 128  ;;  %s1883_s30 = scalar_lea.hbm %s2397_s4, 256 }
 0x519   : > { %p1880_p11 = scmp.ne.s32.totalorder %s1530_s11, %s1879_s18  ;;  %p1884_p0 = scmp.lt.s32.totalorder %s1530_s11, %s2397_s4 }
 0x51a   : > { %p1885_p1 = scmp.lt.s32.totalorder %s1883_s30, %s1879_s18 }
 0x51b   : > { %p1881_p12 = pnand %p1880_p11, %p2017_p5 }
 0x51c   : > { %p1886_p2 = por %p1885_p1, %p1884_p0 }
 0x51d   : > { %p1882_p13 = pneg %p1881_p12 }
 0x51f   : > { %p1887_p10 = pnand %p1886_p2, %p1882_p13 }
 0x521   : > { %1890 = shalt.err (!%p1887_p10)
}
 0x522   : > { %1789 = dma.vmem_to_hbm [thread:$0]  (%p2017_p5), %s1533_s8, 128, %s1530_s11, %s1515_s12   ;;  %v1763_v9 = vpop.f32.mrf.mxu0  ;;  %vm998_vm10 = vcmask 130112   ;;  %vm1250_vm11 = vcmask 195712   ;;  %vm1502_vm12 = vcmask 261312  }
 0x523   : > { %s1947_s7 = smov 16   ;;  %s1948_s9 = smov 24  }
 0x524   : > { %v1240_v10 = vpop.f32.mrf.mxu0 }
 0x525   : > { %1247 = vrot.lane.b32.xlu1 %v1240_v10, %s1947_s7 }
 0x526   : > { %v1774_v11 = vpop.f32.mrf.mxu0 }
 0x528   : > { %v1243_v12 = vpop.f32.mrf.mxu0 }
 0x52a   : > { %v1775_v13 = vpop.f32.mrf.mxu0 }
 0x52c   : > { %v1492_v14 = vpop.f32.mrf.mxu0 }
 0x52d   : > { %1499 = vrot.lane.b32.xlu1 %v1492_v14, %s1948_s9 }
 0x52e   : > { %v1786_v15 = vpop.f32.mrf.mxu0 }
 0x530   : > { %v1495_v16 = vpop.f32.mrf.mxu0 }
 0x532   : > { %v1787_v17 = vpop.f32.mrf.mxu0 }
 0x585   : > { %v996_v18 = vpop.permute.xlu0 %995 }
 0x586   : > { %999 = vst.msk [vmem:[%s2268_s27] sm:$0xff] %vm998_vm10, %v996_v18 }
 0x597   : > { %v1248_v19 = vpop.permute.xlu1 %1247 }
 0x598   : > { %1251 = vst.msk [vmem:[%s2268_s27] sm:$0xff] %vm1250_vm11, %v1248_v19 }
 0x59f   : > { %v1500_v20 = vpop.permute.xlu1 %1499 }
 0x5a0   : > { %1503 = vst.msk [vmem:[%s2268_s27] sm:$0xff] %vm1502_vm12, %v1500_v20 }
 0x5a1 PF: > { %s1554_s26 = sand.u32 1, %s1921_s15   ;;  %p2402_p5 = scmp.ge.s32.totalorder %s1941_s20, 2 }
 0x5a2   : > { %s1555_s8 = scalar_lea.sflag [#allocation6], %s1554_s26 }
 0x5a3   : > { %p1792_p10 = pnand %p2402_p5, %p2028_p9 }
 0x5a5   : > { %p1793_p3 = pneg %p1792_p10 }
 0x5a7   : > { %1916 = dma.done.wait (%p1793_p3), %s1555_s8, 128  }
 0x5a8   : > { %1918 = vsyncadd (%p1793_p3), %s1555_s8, 4294967168  ;;  %s18_s20 = sadd.s32 1, %s1941_s20   ;;  %s2403_s15 = smov %s1925_s16 }
 0x5a9   : > { %p15_p4 = scmp.ge.s32.totalorder %s18_s20, 4   ;;  %s2404_s16 = smov %s1929_s17 }
 0x5aa   : > { %s2405_s17 = smov %s2026_s28  ;;  %s2406_s18 = smov %s1937_s19 }
 0x5ab   : > { %s2407_s19 = smov %s2409_s23  ;;  %17 = sbr.rel (!%p15_p4) target bundleno = 4 (0x4), region = 223 }
 0x5b0   :  { %1560 = vsyncpa [#allocation6], 1 }
 0x5b1   :  { %1562 = vsyncpa [#allocation6 + $0x1], 1 }

</bundles_post_ra>
